<compile_context>
chip_gen: v7x
topology: tpu7x:2x2x1
jax: 0.10.0
libtpu: 0.0.40
codegen_flags: <defaults>
</compile_context>

<pallas_src>
import functools

import jax
import jax.numpy as jnp
from jax.experimental import pallas as pl
from jax.experimental.pallas import tpu as pltpu

EPS = 1e-5            # torch.layer_norm default eps
NEG_SLOPE = 0.01      # nn.LeakyReLU default negative slope
USE_BF16_MXU = False  # set True on v6e/v7x for higher MXU rate (bf16 operands, f32 acc)


# ----------------------------------------------------------------------------
# small helpers used inside the kernel
# ----------------------------------------------------------------------------
def _mm(a, b):
    if USE_BF16_MXU:
        a = a.astype(jnp.bfloat16)
        b = b.astype(jnp.bfloat16)
    return jnp.dot(a, b, preferred_element_type=jnp.float32)


def _lrelu(v):
    return jnp.where(v >= 0, v, NEG_SLOPE * v)


# ----------------------------------------------------------------------------
# The single fused FrameDecoder kernel (one batch element per grid step).
# Channels-first, spatial axis flattened to h*W lanes; complex values kept as
# separate real/imag planes, packed [real; imag] on the sublane axis after conv1.
# ----------------------------------------------------------------------------
def _frame_decoder_kernel(w, xr_ref, xi_ref, skr_ref, ski_ref,
                          uk_ref, s_ref, aff_ref,
                          w1_ref, w2_ref, wid_ref, bias_ref, mask_ref,
                          out_ref):
    c2 = out_ref.shape[1]          # 2 * c_out  (real rows on top, imag rows below)
    hw = out_ref.shape[2]          # h_out * W  (lane axis)

    # --- Upsample(scale=(2,1), bilinear, align_corners=True): real interp matrix ---
    uk = uk_ref[...]
    up_r = _mm(xr_ref[0], uk)                               # (c_in, hw)
    up_i = _mm(xi_ref[0], uk)

    # --- cat((upsample(x), skip), channel axis) ---
    cat_r = jnp.concatenate([up_r, skr_ref[0]], axis=0)     # (ct, hw)
    cat_i = jnp.concatenate([up_i, ski_ref[0]], axis=0)

    # --- MultichannelLayerNorm over H per (channel, w); reduction on the MXU via S ---
    S = s_ref[...]

    def ln(a):
        mu = _mm(a, S)
        c = a - mu
        var = _mm(c * c, S)
        return c * jax.lax.rsqrt(var + EPS)

    nr, ni = ln(cat_r), ln(cat_i)

    # --- complex affine + LeakyReLU (fused epilogue) ---
    g_r, g_i, bt_r, bt_i = aff_ref[0], aff_ref[1], aff_ref[2], aff_ref[3]
    hr = _lrelu(nr * g_r - ni * g_i + bt_r)
    hi = _lrelu(nr * g_i + ni * g_r + bt_i)

    # --- 3x3 complex convs: one batched weight matmul over all 9 taps, then per-tap
    #     lane rotation (XLU) + precomputed border mask (VPU). Rows packed [real; imag]. ---
    taps = tuple((dy, dx) for dy in (-1, 0, 1) for dx in (-1, 0, 1))

    def conv3x3_taps(p_all, acc):
        # p_all[t*c2:(t+1)*c2, s] is tap t's contribution computed at *source* position s;
        # the conv output at s needs it from s + dy*W + dx  ->  lane-roll by -(dy*W + dx),
        # with out-of-image positions zeroed by mask_ref[t].
        for t, (dy, dx) in enumerate(taps):
            part = p_all[t * c2:(t + 1) * c2]
            if dy == 0 and dx == 0:
                acc = acc + part
            else:
                shift = (-(dy * w + dx)) % hw
                acc = acc + pltpu.roll(part, shift, 1) * mask_ref[t]
        return acc

    # conv1: (c_in + c_out) -> c_out complex, bias + LeakyReLU fused
    p1 = _mm(w1_ref[0], hr) + _mm(w1_ref[1], hi)             # (9*c2, hw)
    h1 = _lrelu(conv3x3_taps(p1, bias_ref[0]))               # (c2, hw)

    # identity path: 1x1 complex conv on the pre-norm activations
    idv = _mm(wid_ref[0], cat_r) + _mm(wid_ref[1], cat_i)    # (c2, hw)

    # conv2 + (conv bias + identity bias) + residual; single lane-dense store
    p2 = _mm(w2_ref[...], h1)                                # (9*c2, hw)
    out_ref[0] = conv3x3_taps(p2, idv + bias_ref[1])


# ----------------------------------------------------------------------------
# Parameter construction / packing (done once, outside the jitted forward)
# ----------------------------------------------------------------------------
def bilinear_h_matrix(h_in, h_out):
    """Interp matrix for bilinear upsample along H, align_corners=True."""
    out_idx = jnp.arange(h_out, dtype=jnp.float32)
    pos = out_idx * (h_in - 1) / (h_out - 1)
    lo = jnp.clip(jnp.floor(pos).astype(jnp.int32), 0, h_in - 1)
    hi = jnp.clip(lo + 1, 0, h_in - 1)
    frac = pos - lo.astype(jnp.float32)
    U = jnp.zeros((h_out, h_in), jnp.float32)
    U = U.at[jnp.arange(h_out), lo].add(1.0 - frac)
    U = U.at[jnp.arange(h_out), hi].add(frac)
    return U


def init_params(key, c_in, c_out, h_in, w):
    h_out = 2 * h_in
    ct = c_in + c_out
    ks = jax.random.split(key, 12)
    s = 0.1
    return {
        "U": bilinear_h_matrix(h_in, h_out),
        # MultichannelLayerNorm complex affine: gamma = 1 + 0i, beta = 0
        "g_r": jnp.ones((ct, h_out), jnp.float32),
        "g_i": jnp.zeros((ct, h_out), jnp.float32),
        "bta_r": jnp.zeros((ct, h_out), jnp.float32),
        "bta_i": jnp.zeros((ct, h_out), jnp.float32),
        # conv1: (c_in+c_out) -> c_out, 3x3, complex (OIHW real/imag pair)
        "w1_r": s * jax.random.normal(ks[0], (c_out, ct, 3, 3), jnp.float32),
        "w1_i": s * jax.random.normal(ks[1], (c_out, ct, 3, 3), jnp.float32),
        "b1_r": s * jax.random.normal(ks[2], (c_out,), jnp.float32),
        "b1_i": s * jax.random.normal(ks[3], (c_out,), jnp.float32),
        # conv2: c_out -> c_out, 3x3, complex
        "w2_r": s * jax.random.normal(ks[4], (c_out, c_out, 3, 3), jnp.float32),
        "w2_i": s * jax.random.normal(ks[5], (c_out, c_out, 3, 3), jnp.float32),
        "b2_r": s * jax.random.normal(ks[6], (c_out,), jnp.float32),
        "b2_i": s * jax.random.normal(ks[7], (c_out,), jnp.float32),
        # identity: (c_in+c_out) -> c_out, 1x1, complex
        "wid_r": s * jax.random.normal(ks[8], (c_out, ct), jnp.float32),
        "wid_i": s * jax.random.normal(ks[9], (c_out, ct), jnp.float32),
        "bid_r": s * jax.random.normal(ks[10], (c_out,), jnp.float32),
        "bid_i": s * jax.random.normal(ks[11], (c_out,), jnp.float32),
    }


def prepare_kernel_params(p, w):
    """Pack module params into the lane-dense, kernel-ready forms (run once)."""
    h_out, h_in = p["U"].shape
    c_out, ct = p["wid_r"].shape
    hw_out = h_out * w

    eye_w = jnp.eye(w, dtype=jnp.float32)
    # upsample: up_cf = x_cf @ UK,  UK = kron(U, I_W)^T   (h_in*W, h_out*W)
    UK = jnp.kron(p["U"], eye_w).T
    # layer-norm averaging matrix: (A @ S)[c, h*W+x] = mean_h A[c, h*W+x]
    S = jnp.kron(jnp.full((h_out, h_out), 1.0 / h_out, jnp.float32), eye_w)

    # per-tap validity masks (zero out contributions that would cross the H/W borders)
    sidx = jnp.arange(hw_out, dtype=jnp.int32)
    y, x = sidx // w, sidx % w
    masks = []
    for dy in (-1, 0, 1):
        for dx in (-1, 0, 1):
            ys, xs = y + dy, x + dx
            valid = ((ys >= 0) & (ys < h_out) & (xs >= 0) & (xs < w)).astype(jnp.float32)
            masks.append(valid)
    MASK = jnp.stack(masks).reshape(9, 1, hw_out)

    def taps(wgt):
        return [wgt[:, :, kh, kw] for kh in range(3) for kw in range(3)]

    # conv1 packed weights:  p1 = W1[0] @ hr + W1[1] @ hi  with rows [real; imag] per tap
    w1r, w1i = taps(p["w1_r"]), taps(p["w1_i"])
    W1A = jnp.concatenate([jnp.concatenate([a, b], axis=0) for a, b in zip(w1r, w1i)], axis=0)
    W1B = jnp.concatenate([jnp.concatenate([-b, a], axis=0) for a, b in zip(w1r, w1i)], axis=0)
    W1 = jnp.stack([W1A, W1B])                                  # (2, 9*2*c_out, ct)

    # conv2 packed weights: consume packed [real; imag] rows, produce packed rows per tap
    w2r, w2i = taps(p["w2_r"]), taps(p["w2_i"])
    W2 = jnp.concatenate([jnp.block([[a, -b], [b, a]]) for a, b in zip(w2r, w2i)], axis=0)

    # identity 1x1 packed weights
    WIDA = jnp.concatenate([p["wid_r"], p["wid_i"]], axis=0)
    WIDB = jnp.concatenate([-p["wid_i"], p["wid_r"]], axis=0)
    WID = jnp.stack([WIDA, WIDB])                               # (2, 2*c_out, ct)

    # biases: conv1 bias, and conv2 bias folded with the identity bias
    b1 = jnp.concatenate([p["b1_r"], p["b1_i"]]).reshape(2 * c_out, 1)
    bout = jnp.concatenate([p["b2_r"] + p["bid_r"],
                            p["b2_i"] + p["bid_i"]]).reshape(2 * c_out, 1)
    BIAS = jnp.stack([b1, bout])                                # (2, 2*c_out, 1)

    def expand(a):                                              # (ct, h_out) -> (ct, hw_out)
        return jnp.repeat(a, w, axis=1)

    AFF = jnp.stack([expand(p["g_r"]), expand(p["g_i"]),
                     expand(p["bta_r"]), expand(p["bta_i"])])   # (4, ct, hw_out)

    return {"UK": UK, "S": S, "AFF": AFF, "W1": W1, "W2": W2,
            "WID": WID, "BIAS": BIAS, "MASK": MASK}


# ----------------------------------------------------------------------------
# FrameDecoder.forward (fused single pallas_call)
# ----------------------------------------------------------------------------
def frame_decoder_forward(xr, xi, skr, ski, kp):
    B, c_in, h_in, w = xr.shape
    c_out, h_out = skr.shape[1], skr.shape[2]
    ct = c_in + c_out
    c2 = 2 * c_out
    hw_in = h_in * w
    hw_out = h_out * w

    # free (contiguous) reshapes: NCHW -> channels-first with flattened spatial
    xr2 = xr.reshape(B, c_in, hw_in)
    xi2 = xi.reshape(B, c_in, hw_in)
    skr2 = skr.reshape(B, c_out, hw_out)
    ski2 = ski.reshape(B, c_out, hw_out)

    in_specs = [
        pl.BlockSpec((1, c_in, hw_in), lambda b: (b, 0, 0)),     # xr
        pl.BlockSpec((1, c_in, hw_in), lambda b: (b, 0, 0)),     # xi
        pl.BlockSpec((1, c_out, hw_out), lambda b: (b, 0, 0)),   # skr
        pl.BlockSpec((1, c_out, hw_out), lambda b: (b, 0, 0)),   # ski
        pl.BlockSpec((hw_in, hw_out), lambda b: (0, 0)),         # UK
        pl.BlockSpec((hw_out, hw_out), lambda b: (0, 0)),        # S
        pl.BlockSpec((4, ct, hw_out), lambda b: (0, 0, 0)),      # AFF (g_r, g_i, bt_r, bt_i)
        pl.BlockSpec((2, 9 * c2, ct), lambda b: (0, 0, 0)),      # W1 (packed A/B)
        pl.BlockSpec((9 * c2, c2), lambda b: (0, 0)),            # W2
        pl.BlockSpec((2, c2, ct), lambda b: (0, 0, 0)),          # WID (packed A/B)
        pl.BlockSpec((2, c2, 1), lambda b: (0, 0, 0)),           # BIAS (b1, b2+bid)
        pl.BlockSpec((9, 1, hw_out), lambda b: (0, 0, 0)),       # MASK
    ]
    out_spec = pl.BlockSpec((1, c2, hw_out), lambda b: (b, 0, 0))

    out = pl.pallas_call(
        functools.partial(_frame_decoder_kernel, w),
        out_shape=jax.ShapeDtypeStruct((B, c2, hw_out), jnp.float32),
        grid=(B,),
        in_specs=in_specs,
        out_specs=out_spec,
        compiler_params=pltpu.CompilerParams(
            dimension_semantics=("parallel",)),   # v7x: one batch per TensorCore
    )(xr2, xi2, skr2, ski2,
      kp["UK"], kp["S"], kp["AFF"], kp["W1"], kp["W2"],
      kp["WID"], kp["BIAS"], kp["MASK"])

    out_r = out[:, :c_out].reshape(B, c_out, h_out, w)
    out_i = out[:, c_out:].reshape(B, c_out, h_out, w)
    return out_r, out_i


# ----------------------------------------------------------------------------
# Pure-JAX reference (NCHW, straightforward ops) for correctness checking
# ----------------------------------------------------------------------------
def frame_decoder_reference(xr, xi, skr, ski, p):
    U = p["U"]
    up_r = jnp.einsum("oh,bchw->bcow", U, xr)
    up_i = jnp.einsum("oh,bchw->bcow", U, xi)
    cat_r = jnp.concatenate([up_r, skr], axis=1)
    cat_i = jnp.concatenate([up_i, ski], axis=1)

    def ln(v):
        mu = jnp.mean(v, axis=2, keepdims=True)
        var = jnp.mean(jnp.square(v - mu), axis=2, keepdims=True)
        return (v - mu) * jax.lax.rsqrt(var + EPS)

    nr, ni = ln(cat_r), ln(cat_i)
    g_r = p["g_r"][None, :, :, None]
    g_i = p["g_i"][None, :, :, None]
    bt_r = p["bta_r"][None, :, :, None]
    bt_i = p["bta_i"][None, :, :, None]
    hr = _lrelu(nr * g_r - ni * g_i + bt_r)
    hi = _lrelu(nr * g_i + ni * g_r + bt_i)

    dn = ("NCHW", "OIHW", "NCHW")

    def conv(a, wgt):
        return jax.lax.conv_general_dilated(a, wgt, (1, 1), ((1, 1), (1, 1)),
                                            dimension_numbers=dn)

    h1r = _lrelu(conv(hr, p["w1_r"]) - conv(hi, p["w1_i"])
                 + p["b1_r"][None, :, None, None])
    h1i = _lrelu(conv(hr, p["w1_i"]) + conv(hi, p["w1_r"])
                 + p["b1_i"][None, :, None, None])

    id_r = (jnp.einsum("oc,bchw->bohw", p["wid_r"], cat_r)
            - jnp.einsum("oc,bchw->bohw", p["wid_i"], cat_i)
            + p["bid_r"][None, :, None, None])
    id_i = (jnp.einsum("oc,bchw->bohw", p["wid_i"], cat_r)
            + jnp.einsum("oc,bchw->bohw", p["wid_r"], cat_i)
            + p["bid_i"][None, :, None, None])

    o_r = (conv(h1r, p["w2_r"]) - conv(h1i, p["w2_i"])
           + p["b2_r"][None, :, None, None] + id_r)
    o_i = (conv(h1r, p["w2_i"]) + conv(h1i, p["w2_r"])
           + p["b2_i"][None, :, None, None] + id_i)
    return o_r, o_i


if __name__ == "__main__":
    B, c_in, c_out = 2, 8, 4
    h_in, W = 8, 8            # FrameDecoder `features` == 2*h_in == 16

    key = jax.random.PRNGKey(0)
    k1, k2, k3, k4, k5 = jax.random.split(key, 5)
    x_r = jax.random.normal(k1, (B, c_in, h_in, W), jnp.float32)
    x_i = jax.random.normal(k2, (B, c_in, h_in, W), jnp.float32)
    skip_r = jax.random.normal(k3, (B, c_out, 2 * h_in, W), jnp.float32)
    skip_i = jax.random.normal(k4, (B, c_out, 2 * h_in, W), jnp.float32)

    params = init_params(k5, c_in, c_out, h_in, W)
    kparams = prepare_kernel_params(params, W)   # one-time packing, outside jit

    fwd = jax.jit(frame_decoder_forward)
    out_r, out_i = fwd(x_r, x_i, skip_r, skip_i, kparams)
    jax.block_until_ready((out_r, out_i))

    assert out_r.shape == (B, c_out, 2 * h_in, W)
    assert out_i.shape == (B, c_out, 2 * h_in, W)

    # correctness check against the pure-JAX reference (tolerance covers MXU
    # default-precision effects; structural errors would be O(1) or larger)
    ref_r, ref_i = jax.jit(frame_decoder_reference)(x_r, x_i, skip_r, skip_i, params)
    err = max(float(jnp.max(jnp.abs(out_r - ref_r))),
              float(jnp.max(jnp.abs(out_i - ref_i))))
    assert err < 2e-1, f"kernel/reference mismatch: max abs err = {err}"

    print("KERNEL_OK")
</pallas_src>

<mosaic_0001>
module attributes {stable_mosaic.version = 11 : i64} {
  func.func @_frame_decoder_kernel(%arg0: i32, %arg1: memref<1x8x64xf32, #tpu.memory_space<vmem>>, %arg2: memref<1x8x64xf32, #tpu.memory_space<vmem>>, %arg3: memref<1x4x128xf32, #tpu.memory_space<vmem>>, %arg4: memref<1x4x128xf32, #tpu.memory_space<vmem>>, %arg5: memref<64x128xf32, #tpu.memory_space<vmem>>, %arg6: memref<128x128xf32, #tpu.memory_space<vmem>>, %arg7: memref<4x12x128xf32, #tpu.memory_space<vmem>>, %arg8: memref<2x72x12xf32, #tpu.memory_space<vmem>>, %arg9: memref<72x8xf32, #tpu.memory_space<vmem>>, %arg10: memref<2x8x12xf32, #tpu.memory_space<vmem>>, %arg11: memref<2x8x1xf32, #tpu.memory_space<vmem>>, %arg12: memref<9x1x128xf32, #tpu.memory_space<vmem>>, %arg13: memref<1x8x128xf32, #tpu.memory_space<vmem>>) attributes {dimension_semantics = [#tpu.dimension_semantics<parallel>], iteration_bounds = array<i64: 2>, scalar_prefetch = 0 : i64, scratch_operands = 0 : i64, tpu.core_type = #tpu.core_type<tc>, window_params = [{transform_indices = @transform_0, window_bounds = array<i64: 1, 8, 64>}, {transform_indices = @transform_1, window_bounds = array<i64: 1, 8, 64>}, {transform_indices = @transform_2, window_bounds = array<i64: 1, 4, 128>}, {transform_indices = @transform_3, window_bounds = array<i64: 1, 4, 128>}, {pipeline_mode = #tpu.pipeline_mode<synchronous>, transform_indices = @transform_4, window_bounds = array<i64: 64, 128>}, {pipeline_mode = #tpu.pipeline_mode<synchronous>, transform_indices = @transform_5, window_bounds = array<i64: 128, 128>}, {pipeline_mode = #tpu.pipeline_mode<synchronous>, transform_indices = @transform_6, window_bounds = array<i64: 4, 12, 128>}, {pipeline_mode = #tpu.pipeline_mode<synchronous>, transform_indices = @transform_7, window_bounds = array<i64: 2, 72, 12>}, {pipeline_mode = #tpu.pipeline_mode<synchronous>, transform_indices = @transform_8, window_bounds = array<i64: 72, 8>}, {pipeline_mode = #tpu.pipeline_mode<synchronous>, transform_indices = @transform_9, window_bounds = array<i64: 2, 8, 12>}, {pipeline_mode = #tpu.pipeline_mode<synchronous>, transform_indices = @transform_10, window_bounds = array<i64: 2, 8, 1>}, {pipeline_mode = #tpu.pipeline_mode<synchronous>, transform_indices = @transform_11, window_bounds = array<i64: 9, 1, 128>}, {transform_indices = @transform_12, window_bounds = array<i64: 1, 8, 128>}]} {
    %c0 = arith.constant 0 : index
    %c0_0 = arith.constant 0 : index
    %0 = vector.load %arg5[%c0, %c0_0] : memref<64x128xf32, #tpu.memory_space<vmem>>, vector<64x128xf32>
    %c0_1 = arith.constant 0 : index
    %c0_2 = arith.constant 0 : index
    %c0_3 = arith.constant 0 : index
    %1 = vector.load %arg1[%c0_1, %c0_2, %c0_3] : memref<1x8x64xf32, #tpu.memory_space<vmem>>, vector<1x8x64xf32>
    %2 = vector.shape_cast %1 : vector<1x8x64xf32> to vector<8x64xf32>
    %cst = arith.constant dense<0.000000e+00> : vector<8x128xf32>
    %3 = tpu.matmul %2, %0, %cst {dimension_numbers = #tpu.dot_dimension_numbers<[1], [0], [0], [1], [0, 0, 1, 1], [], []>} : vector<8x64xf32>, vector<64x128xf32>, vector<8x128xf32> -> vector<8x128xf32>
    %c0_4 = arith.constant 0 : index
    %c0_5 = arith.constant 0 : index
    %c0_6 = arith.constant 0 : index
    %4 = vector.load %arg2[%c0_4, %c0_5, %c0_6] : memref<1x8x64xf32, #tpu.memory_space<vmem>>, vector<1x8x64xf32>
    %5 = vector.shape_cast %4 : vector<1x8x64xf32> to vector<8x64xf32>
    %cst_7 = arith.constant dense<0.000000e+00> : vector<8x128xf32>
    %6 = tpu.matmul %5, %0, %cst_7 {dimension_numbers = #tpu.dot_dimension_numbers<[1], [0], [0], [1], [0, 0, 1, 1], [], []>} : vector<8x64xf32>, vector<64x128xf32>, vector<8x128xf32> -> vector<8x128xf32>
    %c0_8 = arith.constant 0 : index
    %c0_9 = arith.constant 0 : index
    %c0_10 = arith.constant 0 : index
    %7 = vector.load %arg3[%c0_8, %c0_9, %c0_10] : memref<1x4x128xf32, #tpu.memory_space<vmem>>, vector<1x4x128xf32>
    %8 = vector.shape_cast %7 : vector<1x4x128xf32> to vector<4x128xf32>
    %9 = tpu.concatenate %3, %8 in 0 : vector<8x128xf32>, vector<4x128xf32> -> vector<12x128xf32>
    %c0_11 = arith.constant 0 : index
    %c0_12 = arith.constant 0 : index
    %c0_13 = arith.constant 0 : index
    %10 = vector.load %arg4[%c0_11, %c0_12, %c0_13] : memref<1x4x128xf32, #tpu.memory_space<vmem>>, vector<1x4x128xf32>
    %11 = vector.shape_cast %10 : vector<1x4x128xf32> to vector<4x128xf32>
    %12 = tpu.concatenate %6, %11 in 0 : vector<8x128xf32>, vector<4x128xf32> -> vector<12x128xf32>
    %c0_14 = arith.constant 0 : index
    %c0_15 = arith.constant 0 : index
    %13 = vector.load %arg6[%c0_14, %c0_15] : memref<128x128xf32, #tpu.memory_space<vmem>>, vector<128x128xf32>
    %cst_16 = arith.constant dense<0.000000e+00> : vector<12x128xf32>
    %14 = tpu.matmul %9, %13, %cst_16 {dimension_numbers = #tpu.dot_dimension_numbers<[1], [0], [0], [1], [0, 0, 1, 1], [], []>} : vector<12x128xf32>, vector<128x128xf32>, vector<12x128xf32> -> vector<12x128xf32>
    %15 = arith.subf %9, %14 : vector<12x128xf32>
    %16 = arith.mulf %15, %15 : vector<12x128xf32>
    %cst_17 = arith.constant dense<0.000000e+00> : vector<12x128xf32>
    %17 = tpu.matmul %16, %13, %cst_17 {dimension_numbers = #tpu.dot_dimension_numbers<[1], [0], [0], [1], [0, 0, 1, 1], [], []>} : vector<12x128xf32>, vector<128x128xf32>, vector<12x128xf32> -> vector<12x128xf32>
    %cst_18 = arith.constant 9.99999974E-6 : f32
    %18 = vector.broadcast %cst_18 : f32 to vector<12x128xf32>
    %19 = arith.addf %17, %18 : vector<12x128xf32>
    %20 = math.rsqrt %19 : vector<12x128xf32>
    %21 = arith.mulf %15, %20 : vector<12x128xf32>
    %cst_19 = arith.constant dense<0.000000e+00> : vector<12x128xf32>
    %22 = tpu.matmul %12, %13, %cst_19 {dimension_numbers = #tpu.dot_dimension_numbers<[1], [0], [0], [1], [0, 0, 1, 1], [], []>} : vector<12x128xf32>, vector<128x128xf32>, vector<12x128xf32> -> vector<12x128xf32>
    %23 = arith.subf %12, %22 : vector<12x128xf32>
    %24 = arith.mulf %23, %23 : vector<12x128xf32>
    %cst_20 = arith.constant dense<0.000000e+00> : vector<12x128xf32>
    %25 = tpu.matmul %24, %13, %cst_20 {dimension_numbers = #tpu.dot_dimension_numbers<[1], [0], [0], [1], [0, 0, 1, 1], [], []>} : vector<12x128xf32>, vector<128x128xf32>, vector<12x128xf32> -> vector<12x128xf32>
    %cst_21 = arith.constant 9.99999974E-6 : f32
    %26 = vector.broadcast %cst_21 : f32 to vector<12x128xf32>
    %27 = arith.addf %25, %26 : vector<12x128xf32>
    %28 = math.rsqrt %27 : vector<12x128xf32>
    %29 = arith.mulf %23, %28 : vector<12x128xf32>
    %c0_22 = arith.constant 0 : index
    %c0_23 = arith.constant 0 : index
    %c0_24 = arith.constant 0 : index
    %30 = vector.load %arg7[%c0_22, %c0_23, %c0_24] : memref<4x12x128xf32, #tpu.memory_space<vmem>>, vector<1x12x128xf32>
    %31 = vector.shape_cast %30 : vector<1x12x128xf32> to vector<12x128xf32>
    %c1 = arith.constant 1 : index
    %c0_25 = arith.constant 0 : index
    %c0_26 = arith.constant 0 : index
    %32 = vector.load %arg7[%c1, %c0_25, %c0_26] : memref<4x12x128xf32, #tpu.memory_space<vmem>>, vector<1x12x128xf32>
    %33 = vector.shape_cast %32 : vector<1x12x128xf32> to vector<12x128xf32>
    %c2 = arith.constant 2 : index
    %c0_27 = arith.constant 0 : index
    %c0_28 = arith.constant 0 : index
    %34 = vector.load %arg7[%c2, %c0_27, %c0_28] : memref<4x12x128xf32, #tpu.memory_space<vmem>>, vector<1x12x128xf32>
    %35 = vector.shape_cast %34 : vector<1x12x128xf32> to vector<12x128xf32>
    %c3 = arith.constant 3 : index
    %c0_29 = arith.constant 0 : index
    %c0_30 = arith.constant 0 : index
    %36 = vector.load %arg7[%c3, %c0_29, %c0_30] : memref<4x12x128xf32, #tpu.memory_space<vmem>>, vector<1x12x128xf32>
    %37 = vector.shape_cast %36 : vector<1x12x128xf32> to vector<12x128xf32>
    %38 = arith.mulf %21, %31 : vector<12x128xf32>
    %39 = arith.mulf %29, %33 : vector<12x128xf32>
    %40 = arith.subf %38, %39 : vector<12x128xf32>
    %41 = arith.addf %40, %35 : vector<12x128xf32>
    %cst_31 = arith.constant 0.000000e+00 : f32
    %42 = vector.broadcast %cst_31 : f32 to vector<12x128xf32>
    %43 = arith.cmpf oge, %41, %42 : vector<12x128xf32>
    %cst_32 = arith.constant 0.00999999977 : f32
    %44 = vector.broadcast %cst_32 : f32 to vector<12x128xf32>
    %45 = arith.mulf %44, %41 : vector<12x128xf32>
    %46 = arith.select %43, %41, %45 : vector<12x128xi1>, vector<12x128xf32>
    %47 = arith.mulf %21, %33 : vector<12x128xf32>
    %48 = arith.mulf %29, %31 : vector<12x128xf32>
    %49 = arith.addf %47, %48 : vector<12x128xf32>
    %50 = arith.addf %49, %37 : vector<12x128xf32>
    %cst_33 = arith.constant 0.000000e+00 : f32
    %51 = vector.broadcast %cst_33 : f32 to vector<12x128xf32>
    %52 = arith.cmpf oge, %50, %51 : vector<12x128xf32>
    %cst_34 = arith.constant 0.00999999977 : f32
    %53 = vector.broadcast %cst_34 : f32 to vector<12x128xf32>
    %54 = arith.mulf %53, %50 : vector<12x128xf32>
    %55 = arith.select %52, %50, %54 : vector<12x128xi1>, vector<12x128xf32>
    %c0_35 = arith.constant 0 : index
    %c0_36 = arith.constant 0 : index
    %c0_37 = arith.constant 0 : index
    %56 = vector.load %arg8[%c0_35, %c0_36, %c0_37] : memref<2x72x12xf32, #tpu.memory_space<vmem>>, vector<1x72x12xf32>
    %57 = vector.shape_cast %56 : vector<1x72x12xf32> to vector<72x12xf32>
    %cst_38 = arith.constant dense<0.000000e+00> : vector<72x128xf32>
    %58 = tpu.matmul %57, %46, %cst_38 {dimension_numbers = #tpu.dot_dimension_numbers<[1], [0], [0], [1], [0, 0, 1, 1], [], []>} : vector<72x12xf32>, vector<12x128xf32>, vector<72x128xf32> -> vector<72x128xf32>
    %c1_39 = arith.constant 1 : index
    %c0_40 = arith.constant 0 : index
    %c0_41 = arith.constant 0 : index
    %59 = vector.load %arg8[%c1_39, %c0_40, %c0_41] : memref<2x72x12xf32, #tpu.memory_space<vmem>>, vector<1x72x12xf32>
    %60 = vector.shape_cast %59 : vector<1x72x12xf32> to vector<72x12xf32>
    %cst_42 = arith.constant dense<0.000000e+00> : vector<72x128xf32>
    %61 = tpu.matmul %60, %55, %cst_42 {dimension_numbers = #tpu.dot_dimension_numbers<[1], [0], [0], [1], [0, 0, 1, 1], [], []>} : vector<72x12xf32>, vector<12x128xf32>, vector<72x128xf32> -> vector<72x128xf32>
    %62 = arith.addf %58, %61 : vector<72x128xf32>
    %c0_43 = arith.constant 0 : index
    %c0_44 = arith.constant 0 : index
    %c0_45 = arith.constant 0 : index
    %63 = vector.load %arg11[%c0_43, %c0_44, %c0_45] : memref<2x8x1xf32, #tpu.memory_space<vmem>>, vector<1x8x1xf32>
    %64 = vector.shape_cast %63 : vector<1x8x1xf32> to vector<8x1xf32>
    %65 = vector.extract_strided_slice %62 {offsets = [0, 0], sizes = [8, 128], strides = [1, 1]} : vector<72x128xf32> to vector<8x128xf32>
    %c9_i32 = arith.constant 9 : i32
    %66 = tpu.dynamic_rotate %65 by %c9_i32 dim 1 : vector<8x128xf32>, i32 -> vector<8x128xf32>
    %c0_46 = arith.constant 0 : index
    %c0_47 = arith.constant 0 : index
    %c0_48 = arith.constant 0 : index
    %67 = vector.load %arg12[%c0_46, %c0_47, %c0_48] : memref<9x1x128xf32, #tpu.memory_space<vmem>>, vector<1x1x128xf32>
    %68 = vector.shape_cast %67 : vector<1x1x128xf32> to vector<1x128xf32>
    %69 = vector.broadcast %68 : vector<1x128xf32> to vector<8x128xf32>
    %70 = arith.mulf %66, %69 : vector<8x128xf32>
    %71 = vector.broadcast %64 : vector<8x1xf32> to vector<8x128xf32>
    %72 = arith.addf %71, %70 : vector<8x128xf32>
    %73 = vector.extract_strided_slice %62 {offsets = [8, 0], sizes = [8, 128], strides = [1, 1]} : vector<72x128xf32> to vector<8x128xf32>
    %c8_i32 = arith.constant 8 : i32
    %74 = tpu.dynamic_rotate %73 by %c8_i32 dim 1 : vector<8x128xf32>, i32 -> vector<8x128xf32>
    %c1_49 = arith.constant 1 : index
    %c0_50 = arith.constant 0 : index
    %c0_51 = arith.constant 0 : index
    %75 = vector.load %arg12[%c1_49, %c0_50, %c0_51] : memref<9x1x128xf32, #tpu.memory_space<vmem>>, vector<1x1x128xf32>
    %76 = vector.shape_cast %75 : vector<1x1x128xf32> to vector<1x128xf32>
    %77 = vector.broadcast %76 : vector<1x128xf32> to vector<8x128xf32>
    %78 = arith.mulf %74, %77 : vector<8x128xf32>
    %79 = arith.addf %72, %78 : vector<8x128xf32>
    %80 = vector.extract_strided_slice %62 {offsets = [16, 0], sizes = [8, 128], strides = [1, 1]} : vector<72x128xf32> to vector<8x128xf32>
    %c7_i32 = arith.constant 7 : i32
    %81 = tpu.dynamic_rotate %80 by %c7_i32 dim 1 : vector<8x128xf32>, i32 -> vector<8x128xf32>
    %c2_52 = arith.constant 2 : index
    %c0_53 = arith.constant 0 : index
    %c0_54 = arith.constant 0 : index
    %82 = vector.load %arg12[%c2_52, %c0_53, %c0_54] : memref<9x1x128xf32, #tpu.memory_space<vmem>>, vector<1x1x128xf32>
    %83 = vector.shape_cast %82 : vector<1x1x128xf32> to vector<1x128xf32>
    %84 = vector.broadcast %83 : vector<1x128xf32> to vector<8x128xf32>
    %85 = arith.mulf %81, %84 : vector<8x128xf32>
    %86 = arith.addf %79, %85 : vector<8x128xf32>
    %87 = vector.extract_strided_slice %62 {offsets = [24, 0], sizes = [8, 128], strides = [1, 1]} : vector<72x128xf32> to vector<8x128xf32>
    %c1_i32 = arith.constant 1 : i32
    %88 = tpu.dynamic_rotate %87 by %c1_i32 dim 1 : vector<8x128xf32>, i32 -> vector<8x128xf32>
    %c3_55 = arith.constant 3 : index
    %c0_56 = arith.constant 0 : index
    %c0_57 = arith.constant 0 : index
    %89 = vector.load %arg12[%c3_55, %c0_56, %c0_57] : memref<9x1x128xf32, #tpu.memory_space<vmem>>, vector<1x1x128xf32>
    %90 = vector.shape_cast %89 : vector<1x1x128xf32> to vector<1x128xf32>
    %91 = vector.broadcast %90 : vector<1x128xf32> to vector<8x128xf32>
    %92 = arith.mulf %88, %91 : vector<8x128xf32>
    %93 = arith.addf %86, %92 : vector<8x128xf32>
    %94 = vector.extract_strided_slice %62 {offsets = [32, 0], sizes = [8, 128], strides = [1, 1]} : vector<72x128xf32> to vector<8x128xf32>
    %95 = arith.addf %93, %94 : vector<8x128xf32>
    %96 = vector.extract_strided_slice %62 {offsets = [40, 0], sizes = [8, 128], strides = [1, 1]} : vector<72x128xf32> to vector<8x128xf32>
    %c127_i32 = arith.constant 127 : i32
    %97 = tpu.dynamic_rotate %96 by %c127_i32 dim 1 : vector<8x128xf32>, i32 -> vector<8x128xf32>
    %c5 = arith.constant 5 : index
    %c0_58 = arith.constant 0 : index
    %c0_59 = arith.constant 0 : index
    %98 = vector.load %arg12[%c5, %c0_58, %c0_59] : memref<9x1x128xf32, #tpu.memory_space<vmem>>, vector<1x1x128xf32>
    %99 = vector.shape_cast %98 : vector<1x1x128xf32> to vector<1x128xf32>
    %100 = vector.broadcast %99 : vector<1x128xf32> to vector<8x128xf32>
    %101 = arith.mulf %97, %100 : vector<8x128xf32>
    %102 = arith.addf %95, %101 : vector<8x128xf32>
    %103 = vector.extract_strided_slice %62 {offsets = [48, 0], sizes = [8, 128], strides = [1, 1]} : vector<72x128xf32> to vector<8x128xf32>
    %c121_i32 = arith.constant 121 : i32
    %104 = tpu.dynamic_rotate %103 by %c121_i32 dim 1 : vector<8x128xf32>, i32 -> vector<8x128xf32>
    %c6 = arith.constant 6 : index
    %c0_60 = arith.constant 0 : index
    %c0_61 = arith.constant 0 : index
    %105 = vector.load %arg12[%c6, %c0_60, %c0_61] : memref<9x1x128xf32, #tpu.memory_space<vmem>>, vector<1x1x128xf32>
    %106 = vector.shape_cast %105 : vector<1x1x128xf32> to vector<1x128xf32>
    %107 = vector.broadcast %106 : vector<1x128xf32> to vector<8x128xf32>
    %108 = arith.mulf %104, %107 : vector<8x128xf32>
    %109 = arith.addf %102, %108 : vector<8x128xf32>
    %110 = vector.extract_strided_slice %62 {offsets = [56, 0], sizes = [8, 128], strides = [1, 1]} : vector<72x128xf32> to vector<8x128xf32>
    %c120_i32 = arith.constant 120 : i32
    %111 = tpu.dynamic_rotate %110 by %c120_i32 dim 1 : vector<8x128xf32>, i32 -> vector<8x128xf32>
    %c7 = arith.constant 7 : index
    %c0_62 = arith.constant 0 : index
    %c0_63 = arith.constant 0 : index
    %112 = vector.load %arg12[%c7, %c0_62, %c0_63] : memref<9x1x128xf32, #tpu.memory_space<vmem>>, vector<1x1x128xf32>
    %113 = vector.shape_cast %112 : vector<1x1x128xf32> to vector<1x128xf32>
    %114 = vector.broadcast %113 : vector<1x128xf32> to vector<8x128xf32>
    %115 = arith.mulf %111, %114 : vector<8x128xf32>
    %116 = arith.addf %109, %115 : vector<8x128xf32>
    %117 = vector.extract_strided_slice %62 {offsets = [64, 0], sizes = [8, 128], strides = [1, 1]} : vector<72x128xf32> to vector<8x128xf32>
    %c119_i32 = arith.constant 119 : i32
    %118 = tpu.dynamic_rotate %117 by %c119_i32 dim 1 : vector<8x128xf32>, i32 -> vector<8x128xf32>
    %c8 = arith.constant 8 : index
    %c0_64 = arith.constant 0 : index
    %c0_65 = arith.constant 0 : index
    %119 = vector.load %arg12[%c8, %c0_64, %c0_65] : memref<9x1x128xf32, #tpu.memory_space<vmem>>, vector<1x1x128xf32>
    %120 = vector.shape_cast %119 : vector<1x1x128xf32> to vector<1x128xf32>
    %121 = vector.broadcast %120 : vector<1x128xf32> to vector<8x128xf32>
    %122 = arith.mulf %118, %121 : vector<8x128xf32>
    %123 = arith.addf %116, %122 : vector<8x128xf32>
    %cst_66 = arith.constant 0.000000e+00 : f32
    %124 = vector.broadcast %cst_66 : f32 to vector<8x128xf32>
    %125 = arith.cmpf oge, %123, %124 : vector<8x128xf32>
    %cst_67 = arith.constant 0.00999999977 : f32
    %126 = vector.broadcast %cst_67 : f32 to vector<8x128xf32>
    %127 = arith.mulf %126, %123 : vector<8x128xf32>
    %128 = arith.select %125, %123, %127 : vector<8x128xi1>, vector<8x128xf32>
    %c0_68 = arith.constant 0 : index
    %c0_69 = arith.constant 0 : index
    %c0_70 = arith.constant 0 : index
    %129 = vector.load %arg10[%c0_68, %c0_69, %c0_70] : memref<2x8x12xf32, #tpu.memory_space<vmem>>, vector<1x8x12xf32>
    %130 = vector.shape_cast %129 : vector<1x8x12xf32> to vector<8x12xf32>
    %cst_71 = arith.constant dense<0.000000e+00> : vector<8x128xf32>
    %131 = tpu.matmul %130, %9, %cst_71 {dimension_numbers = #tpu.dot_dimension_numbers<[1], [0], [0], [1], [0, 0, 1, 1], [], []>} : vector<8x12xf32>, vector<12x128xf32>, vector<8x128xf32> -> vector<8x128xf32>
    %c1_72 = arith.constant 1 : index
    %c0_73 = arith.constant 0 : index
    %c0_74 = arith.constant 0 : index
    %132 = vector.load %arg10[%c1_72, %c0_73, %c0_74] : memref<2x8x12xf32, #tpu.memory_space<vmem>>, vector<1x8x12xf32>
    %133 = vector.shape_cast %132 : vector<1x8x12xf32> to vector<8x12xf32>
    %cst_75 = arith.constant dense<0.000000e+00> : vector<8x128xf32>
    %134 = tpu.matmul %133, %12, %cst_75 {dimension_numbers = #tpu.dot_dimension_numbers<[1], [0], [0], [1], [0, 0, 1, 1], [], []>} : vector<8x12xf32>, vector<12x128xf32>, vector<8x128xf32> -> vector<8x128xf32>
    %135 = arith.addf %131, %134 : vector<8x128xf32>
    %c0_76 = arith.constant 0 : index
    %c0_77 = arith.constant 0 : index
    %136 = vector.load %arg9[%c0_76, %c0_77] : memref<72x8xf32, #tpu.memory_space<vmem>>, vector<72x8xf32>
    %cst_78 = arith.constant dense<0.000000e+00> : vector<72x128xf32>
    %137 = tpu.matmul %136, %128, %cst_78 {dimension_numbers = #tpu.dot_dimension_numbers<[1], [0], [0], [1], [0, 0, 1, 1], [], []>} : vector<72x8xf32>, vector<8x128xf32>, vector<72x128xf32> -> vector<72x128xf32>
    %c1_79 = arith.constant 1 : index
    %c0_80 = arith.constant 0 : index
    %c0_81 = arith.constant 0 : index
    %138 = vector.load %arg11[%c1_79, %c0_80, %c0_81] : memref<2x8x1xf32, #tpu.memory_space<vmem>>, vector<1x8x1xf32>
    %139 = vector.shape_cast %138 : vector<1x8x1xf32> to vector<8x1xf32>
    %140 = vector.broadcast %139 : vector<8x1xf32> to vector<8x128xf32>
    %141 = arith.addf %135, %140 : vector<8x128xf32>
    %142 = vector.extract_strided_slice %137 {offsets = [0, 0], sizes = [8, 128], strides = [1, 1]} : vector<72x128xf32> to vector<8x128xf32>
    %c9_i32_82 = arith.constant 9 : i32
    %143 = tpu.dynamic_rotate %142 by %c9_i32_82 dim 1 : vector<8x128xf32>, i32 -> vector<8x128xf32>
    %c0_83 = arith.constant 0 : index
    %c0_84 = arith.constant 0 : index
    %c0_85 = arith.constant 0 : index
    %144 = vector.load %arg12[%c0_83, %c0_84, %c0_85] : memref<9x1x128xf32, #tpu.memory_space<vmem>>, vector<1x1x128xf32>
    %145 = vector.shape_cast %144 : vector<1x1x128xf32> to vector<1x128xf32>
    %146 = vector.broadcast %145 : vector<1x128xf32> to vector<8x128xf32>
    %147 = arith.mulf %143, %146 : vector<8x128xf32>
    %148 = arith.addf %141, %147 : vector<8x128xf32>
    %149 = vector.extract_strided_slice %137 {offsets = [8, 0], sizes = [8, 128], strides = [1, 1]} : vector<72x128xf32> to vector<8x128xf32>
    %c8_i32_86 = arith.constant 8 : i32
    %150 = tpu.dynamic_rotate %149 by %c8_i32_86 dim 1 : vector<8x128xf32>, i32 -> vector<8x128xf32>
    %c1_87 = arith.constant 1 : index
    %c0_88 = arith.constant 0 : index
    %c0_89 = arith.constant 0 : index
    %151 = vector.load %arg12[%c1_87, %c0_88, %c0_89] : memref<9x1x128xf32, #tpu.memory_space<vmem>>, vector<1x1x128xf32>
    %152 = vector.shape_cast %151 : vector<1x1x128xf32> to vector<1x128xf32>
    %153 = vector.broadcast %152 : vector<1x128xf32> to vector<8x128xf32>
    %154 = arith.mulf %150, %153 : vector<8x128xf32>
    %155 = arith.addf %148, %154 : vector<8x128xf32>
    %156 = vector.extract_strided_slice %137 {offsets = [16, 0], sizes = [8, 128], strides = [1, 1]} : vector<72x128xf32> to vector<8x128xf32>
    %c7_i32_90 = arith.constant 7 : i32
    %157 = tpu.dynamic_rotate %156 by %c7_i32_90 dim 1 : vector<8x128xf32>, i32 -> vector<8x128xf32>
    %c2_91 = arith.constant 2 : index
    %c0_92 = arith.constant 0 : index
    %c0_93 = arith.constant 0 : index
    %158 = vector.load %arg12[%c2_91, %c0_92, %c0_93] : memref<9x1x128xf32, #tpu.memory_space<vmem>>, vector<1x1x128xf32>
    %159 = vector.shape_cast %158 : vector<1x1x128xf32> to vector<1x128xf32>
    %160 = vector.broadcast %159 : vector<1x128xf32> to vector<8x128xf32>
    %161 = arith.mulf %157, %160 : vector<8x128xf32>
    %162 = arith.addf %155, %161 : vector<8x128xf32>
    %163 = vector.extract_strided_slice %137 {offsets = [24, 0], sizes = [8, 128], strides = [1, 1]} : vector<72x128xf32> to vector<8x128xf32>
    %c1_i32_94 = arith.constant 1 : i32
    %164 = tpu.dynamic_rotate %163 by %c1_i32_94 dim 1 : vector<8x128xf32>, i32 -> vector<8x128xf32>
    %c3_95 = arith.constant 3 : index
    %c0_96 = arith.constant 0 : index
    %c0_97 = arith.constant 0 : index
    %165 = vector.load %arg12[%c3_95, %c0_96, %c0_97] : memref<9x1x128xf32, #tpu.memory_space<vmem>>, vector<1x1x128xf32>
    %166 = vector.shape_cast %165 : vector<1x1x128xf32> to vector<1x128xf32>
    %167 = vector.broadcast %166 : vector<1x128xf32> to vector<8x128xf32>
    %168 = arith.mulf %164, %167 : vector<8x128xf32>
    %169 = arith.addf %162, %168 : vector<8x128xf32>
    %170 = vector.extract_strided_slice %137 {offsets = [32, 0], sizes = [8, 128], strides = [1, 1]} : vector<72x128xf32> to vector<8x128xf32>
    %171 = arith.addf %169, %170 : vector<8x128xf32>
    %172 = vector.extract_strided_slice %137 {offsets = [40, 0], sizes = [8, 128], strides = [1, 1]} : vector<72x128xf32> to vector<8x128xf32>
    %c127_i32_98 = arith.constant 127 : i32
    %173 = tpu.dynamic_rotate %172 by %c127_i32_98 dim 1 : vector<8x128xf32>, i32 -> vector<8x128xf32>
    %c5_99 = arith.constant 5 : index
    %c0_100 = arith.constant 0 : index
    %c0_101 = arith.constant 0 : index
    %174 = vector.load %arg12[%c5_99, %c0_100, %c0_101] : memref<9x1x128xf32, #tpu.memory_space<vmem>>, vector<1x1x128xf32>
    %175 = vector.shape_cast %174 : vector<1x1x128xf32> to vector<1x128xf32>
    %176 = vector.broadcast %175 : vector<1x128xf32> to vector<8x128xf32>
    %177 = arith.mulf %173, %176 : vector<8x128xf32>
    %178 = arith.addf %171, %177 : vector<8x128xf32>
    %179 = vector.extract_strided_slice %137 {offsets = [48, 0], sizes = [8, 128], strides = [1, 1]} : vector<72x128xf32> to vector<8x128xf32>
    %c121_i32_102 = arith.constant 121 : i32
    %180 = tpu.dynamic_rotate %179 by %c121_i32_102 dim 1 : vector<8x128xf32>, i32 -> vector<8x128xf32>
    %c6_103 = arith.constant 6 : index
    %c0_104 = arith.constant 0 : index
    %c0_105 = arith.constant 0 : index
    %181 = vector.load %arg12[%c6_103, %c0_104, %c0_105] : memref<9x1x128xf32, #tpu.memory_space<vmem>>, vector<1x1x128xf32>
    %182 = vector.shape_cast %181 : vector<1x1x128xf32> to vector<1x128xf32>
    %183 = vector.broadcast %182 : vector<1x128xf32> to vector<8x128xf32>
    %184 = arith.mulf %180, %183 : vector<8x128xf32>
    %185 = arith.addf %178, %184 : vector<8x128xf32>
    %186 = vector.extract_strided_slice %137 {offsets = [56, 0], sizes = [8, 128], strides = [1, 1]} : vector<72x128xf32> to vector<8x128xf32>
    %c120_i32_106 = arith.constant 120 : i32
    %187 = tpu.dynamic_rotate %186 by %c120_i32_106 dim 1 : vector<8x128xf32>, i32 -> vector<8x128xf32>
    %c7_107 = arith.constant 7 : index
    %c0_108 = arith.constant 0 : index
    %c0_109 = arith.constant 0 : index
    %188 = vector.load %arg12[%c7_107, %c0_108, %c0_109] : memref<9x1x128xf32, #tpu.memory_space<vmem>>, vector<1x1x128xf32>
    %189 = vector.shape_cast %188 : vector<1x1x128xf32> to vector<1x128xf32>
    %190 = vector.broadcast %189 : vector<1x128xf32> to vector<8x128xf32>
    %191 = arith.mulf %187, %190 : vector<8x128xf32>
    %192 = arith.addf %185, %191 : vector<8x128xf32>
    %193 = vector.extract_strided_slice %137 {offsets = [64, 0], sizes = [8, 128], strides = [1, 1]} : vector<72x128xf32> to vector<8x128xf32>
    %c119_i32_110 = arith.constant 119 : i32
    %194 = tpu.dynamic_rotate %193 by %c119_i32_110 dim 1 : vector<8x128xf32>, i32 -> vector<8x128xf32>
    %c8_111 = arith.constant 8 : index
    %c0_112 = arith.constant 0 : index
    %c0_113 = arith.constant 0 : index
    %195 = vector.load %arg12[%c8_111, %c0_112, %c0_113] : memref<9x1x128xf32, #tpu.memory_space<vmem>>, vector<1x1x128xf32>
    %196 = vector.shape_cast %195 : vector<1x1x128xf32> to vector<1x128xf32>
    %197 = vector.broadcast %196 : vector<1x128xf32> to vector<8x128xf32>
    %198 = arith.mulf %194, %197 : vector<8x128xf32>
    %199 = arith.addf %192, %198 : vector<8x128xf32>
    %c0_114 = arith.constant 0 : index
    %c0_115 = arith.constant 0 : index
    %c0_116 = arith.constant 0 : index
    %200 = vector.load %arg13[%c0_114, %c0_115, %c0_116] : memref<1x8x128xf32, #tpu.memory_space<vmem>>, vector<1x8x128xf32>
    %201 = vector.shape_cast %200 : vector<1x8x128xf32> to vector<8x128xf32>
    %202 = vector.shape_cast %199 : vector<8x128xf32> to vector<1x8x128xf32>
    tpu.vector_store %arg13[%c0_114, %c0_115, %c0_116], %202 {strides = array<i32>} : memref<1x8x128xf32, #tpu.memory_space<vmem>>, vector<1x8x128xf32>,
    return
  }
  func.func @transform_0(%arg0: i32) -> (i32, i32, i32) {
    %c0_i32 = arith.constant 0 : i32
    %c0_i32_0 = arith.constant 0 : i32
    %c0_i32_1 = arith.constant 0 : i32
    return %arg0, %c0_i32, %c0_i32_0 : i32, i32, i32
  }
  func.func @transform_1(%arg0: i32) -> (i32, i32, i32) {
    %c0_i32 = arith.constant 0 : i32
    %c0_i32_0 = arith.constant 0 : i32
    %c0_i32_1 = arith.constant 0 : i32
    return %arg0, %c0_i32, %c0_i32_0 : i32, i32, i32
  }
  func.func @transform_2(%arg0: i32) -> (i32, i32, i32) {
    %c0_i32 = arith.constant 0 : i32
    %c0_i32_0 = arith.constant 0 : i32
    %c0_i32_1 = arith.constant 0 : i32
    return %arg0, %c0_i32, %c0_i32_0 : i32, i32, i32
  }
  func.func @transform_3(%arg0: i32) -> (i32, i32, i32) {
    %c0_i32 = arith.constant 0 : i32
    %c0_i32_0 = arith.constant 0 : i32
    %c0_i32_1 = arith.constant 0 : i32
    return %arg0, %c0_i32, %c0_i32_0 : i32, i32, i32
  }
  func.func @transform_4(%arg0: i32) -> (i32, i32) {
    %c0_i32 = arith.constant 0 : i32
    %c0_i32_0 = arith.constant 0 : i32
    %c0_i32_1 = arith.constant 0 : i32
    return %c0_i32, %c0_i32_0 : i32, i32
  }
  func.func @transform_5(%arg0: i32) -> (i32, i32) {
    %c0_i32 = arith.constant 0 : i32
    %c0_i32_0 = arith.constant 0 : i32
    %c0_i32_1 = arith.constant 0 : i32
    return %c0_i32, %c0_i32_0 : i32, i32
  }
  func.func @transform_6(%arg0: i32) -> (i32, i32, i32) {
    %c0_i32 = arith.constant 0 : i32
    %c0_i32_0 = arith.constant 0 : i32
    %c0_i32_1 = arith.constant 0 : i32
    %c0_i32_2 = arith.constant 0 : i32
    return %c0_i32, %c0_i32_0, %c0_i32_1 : i32, i32, i32
  }
  func.func @transform_7(%arg0: i32) -> (i32, i32, i32) {
    %c0_i32 = arith.constant 0 : i32
    %c0_i32_0 = arith.constant 0 : i32
    %c0_i32_1 = arith.constant 0 : i32
    %c0_i32_2 = arith.constant 0 : i32
    return %c0_i32, %c0_i32_0, %c0_i32_1 : i32, i32, i32
  }
  func.func @transform_8(%arg0: i32) -> (i32, i32) {
    %c0_i32 = arith.constant 0 : i32
    %c0_i32_0 = arith.constant 0 : i32
    %c0_i32_1 = arith.constant 0 : i32
    return %c0_i32, %c0_i32_0 : i32, i32
  }
  func.func @transform_9(%arg0: i32) -> (i32, i32, i32) {
    %c0_i32 = arith.constant 0 : i32
    %c0_i32_0 = arith.constant 0 : i32
    %c0_i32_1 = arith.constant 0 : i32
    %c0_i32_2 = arith.constant 0 : i32
    return %c0_i32, %c0_i32_0, %c0_i32_1 : i32, i32, i32
  }
  func.func @transform_10(%arg0: i32) -> (i32, i32, i32) {
    %c0_i32 = arith.constant 0 : i32
    %c0_i32_0 = arith.constant 0 : i32
    %c0_i32_1 = arith.constant 0 : i32
    %c0_i32_2 = arith.constant 0 : i32
    return %c0_i32, %c0_i32_0, %c0_i32_1 : i32, i32, i32
  }
  func.func @transform_11(%arg0: i32) -> (i32, i32, i32) {
    %c0_i32 = arith.constant 0 : i32
    %c0_i32_0 = arith.constant 0 : i32
    %c0_i32_1 = arith.constant 0 : i32
    %c0_i32_2 = arith.constant 0 : i32
    return %c0_i32, %c0_i32_0, %c0_i32_1 : i32, i32, i32
  }
  func.func @transform_12(%arg0: i32) -> (i32, i32, i32) {
    %c0_i32 = arith.constant 0 : i32
    %c0_i32_0 = arith.constant 0 : i32
    %c0_i32_1 = arith.constant 0 : i32
    return %arg0, %c0_i32, %c0_i32_0 : i32, i32, i32
  }
}

</mosaic_0001>

<bundles_post_ra>
// kernel: frame_decoder_forward.1
= control target key start
LH: loop header
LB: loop body
LE: loop exit
PB: predicated region body
PF: predicated region fallthrough
CT: control target
= control target key end

     0   :  { %s2620_s21 = smov 0   ;;  %s3127_s0 = inlined_call_operand.vmem [shape: f32[2,8,64], index: 0, kind: input, shape index: {}]   ;;  %s3128_s1 = inlined_call_operand.vmem [shape: f32[2,8,64], index: 1, kind: input, shape index: {}]   ;;  %s3129_s2 = inlined_call_operand.vmem [shape: f32[2,4,128], index: 2, kind: input, shape index: {}]   ;;  %s3130_s3 = inlined_call_operand.vmem [shape: f32[2,4,128], index: 3, kind: input, shape index: {}]   ;;  %s3131_s4 = inlined_call_operand.vmem [shape: f32[64,128], index: 4, kind: input, shape index: {}]   ;;  %s3132_s5 = inlined_call_operand.vmem [shape: f32[128,128], index: 5, kind: input, shape index: {}]   ;;  %s3133_s6 = inlined_call_operand.vmem [shape: f32[4,12,128], index: 6, kind: input, shape index: {}]   ;;  %s3134_s7 = inlined_call_operand.vmem [shape: f32[2,72,12], index: 7, kind: input, shape index: {}]   ;;  %s3135_s8 = inlined_call_operand.vmem [shape: f32[72,8], index: 8, kind: input, shape index: {}]   ;;  %s3136_s9 = inlined_call_operand.vmem [shape: f32[2,8,12], index: 9, kind: input, shape index: {}]   ;;  %s3137_s10 = inlined_call_operand.vmem [shape: f32[2,8,1], index: 10, kind: input, shape index: {}]   ;;  %s3138_s11 = inlined_call_operand.vmem [shape: f32[9,1,128], index: 11, kind: input, shape index: {}]   ;;  %s3139_s12 = inlined_call_operand.vmem [shape: f32[2,8,128], index: 12, kind: output, shape index: {}]  }
   0x1 LB: > { %s1829_s22 = sadd.s32 4294967295, %s2540_s21   ;;  %p1833_p0 = scmp.ge.s32.totalorder %s2540_s21, 1  ;;  %s2540_s21 = sphi %s2620_s21, %s22_s21  }
   0x2   : > { %p388_p1 = scmp.lt.s32.totalorder %s2540_s21, 3 }
   0x4   : > { %p389_p2 = pnand %p1833_p0, %p388_p1 }
   0x5   : > { %v460_v0 = vld [vmem:[%s3131_s4] sm:$0xff] (!%p389_p2)  ;;  %v461_v1 = vld [vmem:[%s3131_s4 + $0x8] sm:$0xff] (!%p389_p2)  ;;  %v462_v2 = vld [vmem:[%s3131_s4 + $0x10] sm:$0xff] (!%p389_p2)  ;;  %v2542_v3 = vmov (!%p389_p2), 0.0|0.0   ;;  %vm2543_vm0 = vmmov (!%p389_p2), 0   ;;  %v2544_v6 = vmov (!%p389_p2), 0.0  }
   0x6   : > { %392 = sbr.rel (%p389_p2) target bundleno = 1495 (0x5d7), region = 68  ;;  %2319 = vmatprep.subr.bf16.mxu1 (!%p389_p2), %v2542_v3  ;;  %v2320_v4 = vpack.c.bf16 (!%p389_p2), %v461_v1, %v460_v0  ;;  %v463_v5 = vld [vmem:[%s3131_s4 + $0x18] sm:$0xff] (!%p389_p2)  ;;  %2052 = vmatprep.mubr.msk.f32.mxu1 (!%p389_p2), %vm2543_vm0, %v2544_v6  ;;  %p440_p3 = scmp.lt.s32.totalorder (!%p389_p2), %s1829_s22, 1  ;;  %v619_v7 = vld [vmem:[%s3132_s5] sm:$0xff] (!%p389_p2)  ;;  %v620_v9 = vld [vmem:[%s3132_s5 + $0x8] sm:$0xff] (!%p389_p2)  ;;  %vm469_vm1 = vcmask (!%p389_p2), 523264  }
   0x7   : > { %v2323_v8 = vpack.c.bf16 (!%p389_p2), %v463_v5, %v462_v2  ;;  %v621_v10 = vld [vmem:[%s3132_s5 + $0x10] sm:$0xff] (!%p389_p2)  ;;  %v622_v11 = vld [vmem:[%s3132_s5 + $0x18] sm:$0xff] (!%p389_p2)  ;;  %v464_v12 = vld [vmem:[%s3131_s4 + $0x20] sm:$0xff] (!%p389_p2)  ;;  %v2662_v14 = vpack.c.bf16 (!%p389_p2), %v620_v9, %v619_v7  ;;  %vm1037_vm2 = vcmask (!%p389_p2), 1043456   ;;  %vm2545_vm3 = vmmov (!%p389_p2), 1   ;;  %s2549_s14 = smov (!%p389_p2), 7  }
   0x8   : > { %2321 = vmatpush3.bf16.msra.mxu1 (!%p389_p2), %v2320_v4  ;;  %v465_v13 = vld [vmem:[%s3131_s4 + $0x28] sm:$0xff] (!%p389_p2)  ;;  %v2664_v15 = vpack.c.bf16 (!%p389_p2), %v622_v11, %v621_v10  ;;  %v623_v16 = vld [vmem:[%s3132_s5 + $0x20] sm:$0xff] (!%p389_p2)  ;;  %v466_v19 = vld [vmem:[%s3131_s4 + $0x30] sm:$0xff] (!%p389_p2)  ;;  %vm1009_vm5 = vcmask (!%p389_p2), 97280   ;;  %s2550_s15 = smov (!%p389_p2), 1   ;;  %s2551_s18 = smov (!%p389_p2), 127  }
   0x9   : > { %2322 = vmatprep.subr.bf16.mxu1 (!%p389_p2), %v2542_v3  ;;  %v624_v17 = vld [vmem:[%s3132_s5 + $0x28] sm:$0xff] (!%p389_p2)  ;;  %2344 = vmatprep.subr.bf16.mxu0 (!%p389_p2), %v2662_v14  ;;  %v2326_v18 = vpack.c.bf16 (!%p389_p2), %v465_v13, %v464_v12  ;;  %v467_v20 = vld [vmem:[%s3131_s4 + $0x38] sm:$0xff] (!%p389_p2)  ;;  %v625_v22 = vld [vmem:[%s3132_s5 + $0x30] sm:$0xff] (!%p389_p2)  ;;  %s2553_s20 = smov (!%p389_p2), 120   ;;  %s2554_s23 = smov (!%p389_p2), 119   ;;  %vm1560_vm11 = vcmask (!%p389_p2), 64512  }
   0xa   : > { %2346 = vmatpush3.bf16.msra.mxu0 (!%p389_p2), %v2662_v14  ;;  %v2684_v21 = vpack.c.bf16 (!%p389_p2), %v624_v17, %v623_v16  ;;  %v626_v23 = vld [vmem:[%s3132_s5 + $0x38] sm:$0xff] (!%p389_p2)  ;;  %v2329_v24 = vpack.c.bf16 (!%p389_p2), %v467_v20, %v466_v19  ;;  %v627_v26 = vld [vmem:[%s3132_s5 + $0x40] sm:$0xff] (!%p389_p2)  ;;  %v628_v27 = vld [vmem:[%s3132_s5 + $0x48] sm:$0xff] (!%p389_p2) }
   0xb   : > { %2348 = vmatprep.subr.bf16.mxu0 (!%p389_p2), %v2664_v15  ;;  %v2702_v25 = vpack.c.bf16 (!%p389_p2), %v626_v23, %v625_v22  ;;  %v2713_v29 = vpack.c.bf16 (!%p389_p2), %v628_v27, %v627_v26  ;;  %v629_v30 = vld [vmem:[%s3132_s5 + $0x50] sm:$0xff] (!%p389_p2)  ;;  %v630_v31 = vld [vmem:[%s3132_s5 + $0x58] sm:$0xff] (!%p389_p2)  ;;  %v631_v33 = vld [vmem:[%s3132_s5 + $0x60] sm:$0xff] (!%p389_p2) }
   0xc   : > { %2324 = vmatpush3.bf16.msra.mxu1 (!%p389_p2), %v2323_v8  ;;  %v2727_v32 = vpack.c.bf16 (!%p389_p2), %v630_v31, %v629_v30  ;;  %v632_v34 = vld [vmem:[%s3132_s5 + $0x68] sm:$0xff] (!%p389_p2)  ;;  %v633_v36 = vld [vmem:[%s3132_s5 + $0x70] sm:$0xff] (!%p389_p2)  ;;  %v634_v37 = vld [vmem:[%s3132_s5 + $0x78] sm:$0xff] (!%p389_p2) }
   0xd   : > { %s3143_s22 = smov (!%p440_p3, %s1829_s22), 1  ;;  %2325 = vmatprep.subr.bf16.mxu1 %v2542_v3  ;;  %v2738_v35 = vpack.c.bf16 %v632_v34, %v631_v33  ;;  %v2753_v38 = vpack.c.bf16 %v634_v37, %v633_v36  ;;  %vm2826_vm4 = vmpackc.low %vm1037_vm2, %vm2545_vm3  ;;  %v1891_v60 = vld [vmem:[%s3136_s9 + $0x8] sm:$0xff]  ;;  %v1842_v13 = vld [vmem:[%s3133_s6 + $0x18] sm:$0xf] }
   0xe   : > { %s2687_s17 = sshll.u32 %s3143_s22, 3  ;;  %2350 = vmatpush3.bf16.msra.mxu0 %v2664_v15  ;;  %s1836_s13 = sshll.u32 %s3143_s22, 2  ;;  %v952_v12 = vld [vmem:[%s3133_s6 + $0x8] sm:$0xf]  ;;  %v951_v16 = vld [vmem:[%s3133_s6] sm:$0xff]  ;;  %v1841_v17 = vld [vmem:[%s3133_s6 + $0x10] sm:$0xff] }
   0xf   : > { %s443_s26 = scalar_lea.vmem %s3127_s0, %s2687_s17  ;;  %2352 = vmatprep.subr.bf16.mxu0 %v2684_v21  ;;  %s447_s30 = scalar_lea.vmem %s3128_s1, %s2687_s17  ;;  %v1843_v33 = vld [vmem:[%s3133_s6 + $0x20] sm:$0xff] }
  0x10   : > { %2327 = vmatpush3.bf16.msra.mxu1 %v2326_v18  ;;  %v468_v28 = vld [vmem:[%s443_s26] sm:$0xff]  ;;  %s451_s16 = scalar_lea.vmem %s3129_s2, %s1836_s13  ;;  %s455_s19 = scalar_lea.vmem %s3130_s3, %s1836_s13 }
  0x11   : > { %2328 = vmatprep.subr.bf16.mxu1 %v2542_v3  ;;  %v543_v39 = vld [vmem:[%s447_s30] sm:$0xff]  ;;  %s2547_s30 = smov 9   ;;  %s2548_s13 = smov 8  }
  0x12   : > { %2354 = vmatpush3.bf16.msra.mxu0 %v2684_v21  ;;  %v2781_v40 = vld [vmem:[%s451_s16] sm:$0xf] }
  0x13   : > { %2356 = vmatprep.subr.bf16.mxu0 %v2702_v25  ;;  %v618_v45 = vld [vmem:[%s455_s19] sm:$0xf]  ;;  %s2552_s19 = smov 121  }
  0x14   : > { %2330 = vmatpush3.bf16.msra.mxu1 %v2329_v24  ;;  %v990_v58 = vld [vmem:[%s3134_s7] sm:$0xff] }
  0x15   : > { %2331 = vmatprep.subr.bf16.mxu1 %v2542_v3 }
  0x16   : > { %2358 = vmatpush3.bf16.msra.mxu0 %v2702_v25 }
  0x17   : > { %2053 = vmatmul.mubr.msk.f32.vlgmr.msra.gmra.mrb[0].mxu1 %vm469_vm1, %v468_v28  ;;  %2360 = vmatprep.subr.bf16.mxu0 %v2713_v29  ;;  %v1846_v28 = vld [vmem:[%s3133_s6 + $0x38] sm:$0xf] }
  0x18   : > { %2333 = vmatpush3.bf16.msra.mxu1 %v2320_v4  ;;  %2071 = vmatprep.mubr.msk.f32.mxu1 %vm2543_vm0, %v2544_v6 }
  0x19   : > { %2334 = vmatprep.subr.bf16.mxu1 %v2542_v3 }
  0x1a   : > { %2362 = vmatpush3.bf16.msra.mxu0 %v2713_v29 }
  0x1b   : > { %2364 = vmatprep.subr.bf16.mxu0 %v2727_v32 }
  0x1c   : > { %2336 = vmatpush3.bf16.msra.mxu1 %v2323_v8 }
  0x1d   : > { %2337 = vmatprep.subr.bf16.mxu1 %v2542_v3 }
  0x1e   : > { %2366 = vmatpush3.bf16.msra.mxu0 %v2727_v32 }
  0x1f   : > { %2368 = vmatprep.subr.bf16.mxu0 %v2738_v35 }
  0x20   : > { %2339 = vmatpush3.bf16.msra.mxu1 %v2326_v18 }
  0x21   : > { %2340 = vmatprep.subr.bf16.mxu1 %v2542_v3 }
  0x22   : > { %2370 = vmatpush3.bf16.msra.mxu0 %v2738_v35 }
  0x23   : > { %2372 = vmatprep.subr.bf16.mxu0 %v2753_v38 }
  0x24   : > { %2342 = vmatpush3.bf16.msra.mxu1 %v2329_v24 }
  0x25   : > { %2376 = vmatprep.subr.bf16.mxu1 %v2662_v14 }
  0x26   : > { %2374 = vmatpush3.bf16.msra.mxu0 %v2753_v38 }
  0x27   : > { %2072 = vmatmul.mubr.msk.f32.vlgmr.msra.gmra.mrb[2].mxu1 %vm469_vm1, %v543_v39  ;;  %2408 = vmatprep.subr.bf16.mxu0 %v2662_v14 }
  0x28   : > { %2378 = vmatpush3.bf16.msra.mxu1 %v2662_v14 }
  0x29   : > { %2380 = vmatprep.subr.bf16.mxu1 %v2664_v15 }
  0x2c   : > { %2382 = vmatpush3.bf16.msra.mxu1 %v2664_v15 }
  0x2d   : > { %2384 = vmatprep.subr.bf16.mxu1 %v2684_v21 }
  0x30   : > { %2386 = vmatpush3.bf16.msra.mxu1 %v2684_v21 }
  0x31   : > { %2388 = vmatprep.subr.bf16.mxu1 %v2702_v25 }
  0x34   : > { %2390 = vmatpush3.bf16.msra.mxu1 %v2702_v25 }
  0x35   : > { %2392 = vmatprep.subr.bf16.mxu1 %v2713_v29 }
  0x38   : > { %2394 = vmatpush3.bf16.msra.mxu1 %v2713_v29 }
  0x39   : > { %2396 = vmatprep.subr.bf16.mxu1 %v2727_v32 }
  0x3c   : > { %2398 = vmatpush3.bf16.msra.mxu1 %v2727_v32 }
  0x3d   : > { %2400 = vmatprep.subr.bf16.mxu1 %v2738_v35 }
  0x40   : > { %2402 = vmatpush3.bf16.msra.mxu1 %v2738_v35 }
  0x41   : > { %2404 = vmatprep.subr.bf16.mxu1 %v2753_v38 }
  0x44   : > { %2406 = vmatpush3.bf16.msra.mxu1 %v2753_v38 }
  0x45   : > { %2440 = vmatprep.subr.bf16.mxu1 %v2662_v14 }
  0xea   : > { %v2783_v41 = vpop.f32.mrb[0].mxu1 }
  0xeb   : > { %v2054_v42 = vpop.f32.mrb[1].mxu1  ;;  %2106 = vmatprep.mubr.f32.mxu0 %v2783_v41  ;;  %v2484_v61 = vpack.c.bf16 %v2781_v40, %v2783_v41 }
  0xec   : > { %2107 = vmatmul.mubr.f32.vlgmr.msra.gmra.mrb[0].mxu0 %v2781_v40 }
  0xed   : > { %2410 = vmatpush3.bf16.msra.mxu0 %v2662_v14 }
  0xee   : > { %2412 = vmatprep.subr.bf16.mxu0 %v2664_v15 }
  0xf1   : > { %2414 = vmatpush3.bf16.msra.mxu0 %v2664_v15 }
  0xf2   : > { %2416 = vmatprep.subr.bf16.mxu0 %v2684_v21 }
  0xf5   : > { %2418 = vmatpush3.bf16.msra.mxu0 %v2684_v21 }
  0xf6   : > { %2420 = vmatprep.subr.bf16.mxu0 %v2702_v25 }
  0xf9   : > { %2422 = vmatpush3.bf16.msra.mxu0 %v2702_v25 }
  0xfa   : > { %2424 = vmatprep.subr.bf16.mxu0 %v2713_v29  ;;  %v613_v43 = vpop.f32.mrb[2].mxu1 }
  0xfb   : > { %v2073_v44 = vpop.f32.mrb[3].mxu1  ;;  %2176 = vmatprep.mubr.f32.mxu0 %v613_v43  ;;  %v2480_v59 = vpack.c.bf16 %v618_v45, %v613_v43 }
  0xfd   : > { %2426 = vmatpush3.bf16.msra.mxu0 %v2713_v29 }
  0xfe   : > { %2428 = vmatprep.subr.bf16.mxu0 %v2727_v32 }
 0x101   : > { %2430 = vmatpush3.bf16.msra.mxu0 %v2727_v32 }
 0x102   : > { %2432 = vmatprep.subr.bf16.mxu0 %v2738_v35 }
 0x105   : > { %2434 = vmatpush3.bf16.msra.mxu0 %v2738_v35 }
 0x106   : > { %2436 = vmatprep.subr.bf16.mxu0 %v2753_v38 }
 0x109   : > { %2438 = vmatpush3.bf16.msra.mxu0 %v2753_v38 }
 0x10a   : > { %2471 = vmatprep.subr.bf16.mxu0 %v2542_v3 }
 0x10c   : > { %2177 = vmatmul.mubr.f32.vlgmr.msra.gmra.mrb[2].mxu0 %v618_v45 }
 0x10d   : > { %2218 = vmatprep.mubr.msk.f32.mxu0 %vm2543_vm0, %v2544_v6 }
 0x1bf   : > { %v2108_v46 = vpop.f32.mrb[0].mxu0 }
 0x1c0   : > { %v711_v47 = vsub.f32 %v2781_v40, %v2108_v46  ;;  %v701_v48 = vpop.f32.mrb[1].mxu0 }
 0x1c1   : > { %v710_v49 = vsub.f32 %v2783_v41, %v701_v48 }
 0x1c2   : > { %v713_v51 = vmul.f32 %v711_v47, %v711_v47 }
 0x1c3   : > { %v712_v50 = vmul.f32 %v710_v49, %v710_v49 }
 0x1c5   : > { %2141 = vmatprep.mubr.f32.mxu1 %v712_v50  ;;  %v1847_v50 = vld [vmem:[%s3134_s7 + $0x48] sm:$0xff] }
 0x1c6   : > { %2142 = vmatmul.mubr.f32.vlgmr.msra.gmra.mrb[4].mxu1 %v713_v51  ;;  %v1848_v51 = vld [vmem:[%s3134_s7 + $0x50] sm:$0xff] }
 0x1c7   : > { %2442 = vmatpush3.bf16.msra.mxu1 %v2662_v14 }
 0x1c8   : > { %2444 = vmatprep.subr.bf16.mxu1 %v2664_v15 }
 0x1cb   : > { %2446 = vmatpush3.bf16.msra.mxu1 %v2664_v15 }
 0x1cc   : > { %2448 = vmatprep.subr.bf16.mxu1 %v2684_v21 }
 0x1cf   : > { %2450 = vmatpush3.bf16.msra.mxu1 %v2684_v21 }
 0x1d0   : > { %2452 = vmatprep.subr.bf16.mxu1 %v2702_v25 }
 0x1d3   : > { %2454 = vmatpush3.bf16.msra.mxu1 %v2702_v25 }
 0x1d4   : > { %2456 = vmatprep.subr.bf16.mxu1 %v2713_v29 }
 0x1d7   : > { %2458 = vmatpush3.bf16.msra.mxu1 %v2713_v29  ;;  %v1844_v29 = vld [vmem:[%s3133_s6 + $0x28] sm:$0xf] }
 0x1d8   : > { %2460 = vmatprep.subr.bf16.mxu1 %v2727_v32 }
 0x1db   : > { %2462 = vmatpush3.bf16.msra.mxu1 %v2727_v32  ;;  %v1845_v32 = vld [vmem:[%s3133_s6 + $0x30] sm:$0xff] }
 0x1dc   : > { %2464 = vmatprep.subr.bf16.mxu1 %v2738_v35 }
 0x1df   : > { %v2178_v52 = vpop.f32.mrb[2].mxu0  ;;  %2466 = vmatpush3.bf16.msra.mxu1 %v2738_v35 }
 0x1e0   : > { %v869_v53 = vsub.f32 %v618_v45, %v2178_v52  ;;  %v859_v54 = vpop.f32.mrb[3].mxu0  ;;  %2468 = vmatprep.subr.bf16.mxu1 %v2753_v38  ;;  %v1850_v52 = vld [vmem:[%s3134_s7 + $0x60] sm:$0xff] }
 0x1e1   : > { %v868_v55 = vsub.f32 %v613_v43, %v859_v54  ;;  %v1852_v54 = vld [vmem:[%s3134_s7 + $0x70] sm:$0xff] }
 0x1e2   : > { %v871_v57 = vmul.f32 %v869_v53, %v869_v53 }
 0x1e3   : > { %v870_v56 = vmul.f32 %v868_v55, %v868_v55  ;;  %2470 = vmatpush3.bf16.msra.mxu1 %v2753_v38 }
 0x1e4   : > { %2479 = vmatprep.subr.bf16.mxu1 %v2542_v3 }
 0x1e5   : > { %2211 = vmatprep.mubr.f32.mxu1 %v870_v56  ;;  %v1854_v56 = vld [vmem:[%s3134_s7 + $0x80] sm:$0xff] }
 0x1e6   : > { %2212 = vmatmul.mubr.f32.vlgmr.msra.gmra.mrb[6].mxu1 %v871_v57  ;;  %v1855_v57 = vld [vmem:[%s3134_s7 + $0x88] sm:$0xff] }
 0x1e7   : > { %2482 = vmatpush3.bf16.msk.msra.mxu1 %vm2826_vm4, %v2480_v59  ;;  %2280 = vmatprep.mubr.msk.f32.mxu1 %vm2543_vm0, %v2544_v6  ;;  %v991_v59 = vld [vmem:[%s3134_s7 + $0x8] sm:$0xff] }
 0x1e8   : > { %2483 = vmatprep.subr.bf16.mxu1 %v2542_v3 }
 0x1ea   : > { %2281 = vmatmul.mubr.msk.f32.vlgmr.msra.gmra.mrb[8].mxu1 %vm1009_vm5, %v1891_v60  ;;  %v992_v60 = vld [vmem:[%s3134_s7 + $0x10] sm:$0xff] }
 0x1eb   : > { %2486 = vmatpush3.bf16.msk.msra.mxu1 %vm2826_vm4, %v2484_v61  ;;  %2287 = vmatprep.mubr.msk.f32.mxu1 %vm2543_vm0, %v2544_v6  ;;  %v993_v61 = vld [vmem:[%s3134_s7 + $0x18] sm:$0xff] }
 0x1ec   : > { %2290 = vmatprep.subr.mxu1 %v2544_v6 }
 0x299   : > { %v2143_v62 = vpop.f32.mrb[4].mxu1 }
 0x29a   : > { %v780_v63 = vpop.f32.mrb[5].mxu1  ;;  %v786_v0 = vadd.f32 1e-05, %v2143_v62  ;;  %v994_v62 = vld [vmem:[%s3134_s7 + $0x20] sm:$0xff] }
 0x29b   : > { %v781_v1 = vadd.f32 1e-05, %v780_v63  ;;  %v995_v63 = vld [vmem:[%s3134_s7 + $0x28] sm:$0xff] }
 0x29c   : > { %2526 = vrsqrt.f32 %v786_v0  ;;  %v996_v0 = vld [vmem:[%s3134_s7 + $0x30] sm:$0xff] }
 0x29d   : > { %2528 = vrsqrt.f32 %v781_v1  ;;  %v997_v1 = vld [vmem:[%s3134_s7 + $0x38] sm:$0xff] }
 0x2a6   : > { %v2527_v8 = vpop.eup %2526 }
 0x2a7   : > { %v2529_v9 = vpop.eup %2528  ;;  %v792_v10 = vmul.f32 %v2527_v8, %v711_v47 }
 0x2a8   : > { %v791_v14 = vmul.f32 %v2529_v9, %v710_v49 }
 0x2a9   : > { %v963_v20 = vmul.f32 %v952_v12, %v792_v10  ;;  %v977_v21 = vmul.f32 %v1842_v13, %v792_v10 }
 0x2aa   : > { %v962_v24 = vmul.f32 %v951_v16, %v791_v14  ;;  %v976_v25 = vmul.f32 %v1841_v17, %v791_v14 }
 0x2b9   : > { %v2213_v2 = vpop.f32.mrb[6].mxu1 }
 0x2ba   : > { %v944_v4 = vadd.f32 1e-05, %v2213_v2  ;;  %v938_v5 = vpop.f32.mrb[7].mxu1  ;;  %v998_v2 = vld [vmem:[%s3134_s7 + $0x40] sm:$0xff] }
 0x2bb   : > { %v939_v7 = vadd.f32 1e-05, %v938_v5  ;;  %v2546_v5 = vmov 0  }
 0x2bc   : > { %2530 = vrsqrt.f32 %v944_v4  ;;  %v1291_v4 = vld [vmem:[%s3137_s10] sm:$0xff]  ;;  %2524 = vset.pattern.permute.xlu0 %v2546_v5  ;;  %2525 = vset.pattern.permute.xlu1 %v2546_v5  ;;  %v1552_v5 = vld [vmem:[%s3135_s8 + $0x8] sm:$0xff] }
 0x2bd   : > { %2532 = vrsqrt.f32 %v939_v7  ;;  %1304 = vperm.xlu0 %2524, %v1291_v4  }
 0x2c6   : > { %v2531_v11 = vpop.eup %2530 }
 0x2c7   : > { %v2533_v15 = vpop.eup %2532  ;;  %v950_v18 = vmul.f32 %v2531_v11, %v869_v53  ;;  %v1851_v53 = vld [vmem:[%s3134_s7 + $0x68] sm:$0xff] }
 0x2c8   : > { %v949_v19 = vmul.f32 %v2533_v15, %v868_v55  ;;  %v1853_v55 = vld [vmem:[%s3134_s7 + $0x78] sm:$0xff] }
 0x2c9   : > { %v965_v22 = vmul.f32 %v1842_v13, %v950_v18  ;;  %v979_v23 = vmul.f32 %v952_v12, %v950_v18 }
 0x2ca   : > { %v964_v26 = vmul.f32 %v1841_v17, %v949_v19  ;;  %v978_v27 = vmul.f32 %v951_v16, %v949_v19 }
 0x2cb   : > { %v967_v30 = vsub.f32 %v963_v20, %v965_v22  ;;  %v981_v31 = vadd.f32 %v979_v23, %v977_v21  ;;  %v1396_v20 = vld [vmem:[%s3136_s9] sm:$0xff] }
 0x2cc   : > { %v966_v34 = vsub.f32 %v962_v24, %v964_v26  ;;  %v980_v35 = vadd.f32 %v978_v27, %v976_v25  ;;  %2288 = vmatmul.mubr.msk.f32.vlgmr.msra.gmra.mrb[10].mxu1 %vm1009_vm5, %v1396_v20 }
 0x2cd   : > { %v983_v36 = vadd.f32 %v1846_v28, %v981_v31  ;;  %v969_v37 = vadd.f32 %v1844_v29, %v967_v30  ;;  %2292 = vmatprep.mubr.msk.f32.mxu1 %vm2543_vm0, %v2544_v6  ;;  %v1905_v29 = vld [vmem:[%s3137_s10 + $0x8] sm:$0xff]  ;;  %v3001_v30 = vpop.f32.mrb[8].mxu1 }
 0x2ce   : > { %v982_v38 = vadd.f32 %v1845_v32, %v980_v35  ;;  %v968_v39 = vadd.f32 %v1843_v33, %v966_v34  ;;  %v2282_v31 = vpop.f32.mrb[9].mxu1  ;;  %v3006_v34 = vld [vmem:[%s3138_s11] ss:$0 sm:$0xff] }
 0x2cf   : > { %vm985_vm6 = vcmp.ge.f32.partialorder %v983_v36, 0.0  ;;  %v987_v40 = vmul.f32 0.01, %v983_v36  ;;  %vm971_vm7 = vcmp.ge.f32.partialorder %v969_v37, 0.0  ;;  %v973_v41 = vmul.f32 0.01, %v969_v37 }
 0x2d0   : > { %vm984_vm8 = vcmp.ge.f32.partialorder %v982_v38, 0.0  ;;  %v986_v42 = vmul.f32 0.01, %v982_v38  ;;  %vm970_vm9 = vcmp.ge.f32.partialorder %v968_v39, 0.0  ;;  %v972_v43 = vmul.f32 0.01, %v968_v39 }
 0x2d1   : > { %v989_v44 = vsel %vm985_vm6, %v983_v36, %v987_v40  ;;  %v975_v45 = vsel %vm971_vm7, %v969_v37, %v973_v41  ;;  %v3011_v36 = vld [vmem:[%s3138_s11 + $0x1] ss:$0 sm:$0xff]  ;;  %v3023_v41 = vld [vmem:[%s3138_s11 + $0x3] ss:$0 sm:$0xff] }
 0x2d2   : > { %v988_v46 = vsel %vm984_vm8, %v982_v38, %v986_v42  ;;  %v974_v47 = vsel %vm970_vm9, %v968_v39, %v972_v43  ;;  %v3017_v38 = vld [vmem:[%s3138_s11 + $0x2] ss:$0 sm:$0xff] }
 0x2d3   : > { %v2472_v48 = vpack.c.bf16 %v989_v44, %v988_v46  ;;  %v2476_v49 = vpack.c.bf16 %v975_v45, %v974_v47 }
 0x2d5   : > { %2474 = vmatpush3.bf16.msk.msra.mxu0 %vm2826_vm4, %v2472_v48  ;;  %v3030_v48 = vld [vmem:[%s3138_s11 + $0x5] ss:$0 sm:$0xff] }
 0x2d6   : > { %2475 = vmatprep.subr.bf16.mxu0 %v2542_v3  ;;  %v1849_v3 = vld [vmem:[%s3134_s7 + $0x58] sm:$0xff] }
 0x2d8   : > { %2219 = vmatmul.mubr.msk.f32.vlgmr.msra.gmra.mrb[4].mxu0 %vm1009_vm5, %v1847_v50 }
 0x2d9   : > { %2478 = vmatpush3.bf16.msk.msra.mxu0 %vm2826_vm4, %v2476_v49  ;;  %2221 = vmatprep.mubr.msk.f32.mxu0 %vm2543_vm0, %v2544_v6 }
 0x2dc   : > { %2222 = vmatmul.mubr.msk.f32.gmra.mrb[6].mxu0 %vm1009_vm5, %v1848_v51  ;;  %v3035_v51 = vld [vmem:[%s3138_s11 + $0x6] ss:$0 sm:$0xff] }
 0x2dd   : > { %2224 = vmatprep.mubr.msk.f32.mxu0 %vm2543_vm0, %v2544_v6 }
 0x2e0   : > { %2225 = vmatmul.mubr.msk.f32.gmra.mrb[8].mxu0 %vm1009_vm5, %v1849_v3 }
 0x2e1   : > { %2227 = vmatprep.mubr.msk.f32.mxu0 %vm2543_vm0, %v2544_v6 }
 0x2e4   : > { %2228 = vmatmul.mubr.msk.f32.gmra.mrb[10].mxu0 %vm1009_vm5, %v1850_v52 }
 0x2e5   : > { %2230 = vmatprep.mubr.msk.f32.mxu0 %vm2543_vm0, %v2544_v6 }
 0x2e8   : > { %2231 = vmatmul.mubr.msk.f32.gmra.mrb[12].mxu0 %vm1009_vm5, %v1851_v53  ;;  %v3041_v53 = vld [vmem:[%s3138_s11 + $0x7] ss:$0 sm:$0xff] }
 0x2e9   : > { %2233 = vmatprep.mubr.msk.f32.mxu0 %vm2543_vm0, %v2544_v6 }
 0x2ec   : > { %2234 = vmatmul.mubr.msk.f32.gmra.mrb[14].mxu0 %vm1009_vm5, %v1852_v54 }
 0x2ed   : > { %2236 = vmatprep.mubr.msk.f32.mxu0 %vm2543_vm0, %v2544_v6 }
 0x2f0   : > { %2237 = vmatmul.mubr.msk.f32.gmra.mrb[16].mxu0 %vm1009_vm5, %v1853_v55 }
 0x2f1   : > { %2239 = vmatprep.mubr.msk.f32.mxu0 %vm2543_vm0, %v2544_v6 }
 0x2f4   : > { %2240 = vmatmul.mubr.msk.f32.gmra.mrb[18].mxu0 %vm1009_vm5, %v1854_v56 }
 0x2f5   : > { %2242 = vmatprep.mubr.msk.f32.mxu0 %vm2543_vm0, %v2544_v6 }
 0x2f8   : > { %2243 = vmatmul.mubr.msk.f32.gmra.mrb[20].mxu0 %vm1009_vm5, %v1855_v57 }
 0x2f9   : > { %2249 = vmatprep.mubr.msk.f32.mxu0 %vm2543_vm0, %v2544_v6 }
 0x2fc   : > { %2250 = vmatmul.mubr.msk.f32.vlgmr.msra.gmra.mrb[4].mxu0 %vm1009_vm5, %v990_v58 }
 0x2fd   : > { %2252 = vmatprep.mubr.msk.f32.mxu0 %vm2543_vm0, %v2544_v6 }
 0x300   : > { %2253 = vmatmul.mubr.msk.f32.gmra.mrb[6].mxu0 %vm1009_vm5, %v991_v59  ;;  %v3048_v59 = vld [vmem:[%s3138_s11 + $0x8] ss:$0 sm:$0xff] }
 0x301   : > { %2255 = vmatprep.mubr.msk.f32.mxu0 %vm2543_vm0, %v2544_v6 }
 0x304   : > { %2256 = vmatmul.mubr.msk.f32.gmra.mrb[8].mxu0 %vm1009_vm5, %v992_v60 }
 0x305   : > { %2258 = vmatprep.mubr.msk.f32.mxu0 %vm2543_vm0, %v2544_v6 }
 0x308   : > { %2259 = vmatmul.mubr.msk.f32.gmra.mrb[10].mxu0 %vm1009_vm5, %v993_v61 }
 0x309   : > { %2261 = vmatprep.mubr.msk.f32.mxu0 %vm2543_vm0, %v2544_v6 }
 0x30c   : > { %2262 = vmatmul.mubr.msk.f32.gmra.mrb[22].mxu0 %vm1009_vm5, %v994_v62 }
 0x30d   : > { %2264 = vmatprep.mubr.msk.f32.mxu0 %vm2543_vm0, %v2544_v6 }
 0x310   : > { %2265 = vmatmul.mubr.msk.f32.gmra.mrb[14].mxu0 %vm1009_vm5, %v995_v63 }
 0x311   : > { %2267 = vmatprep.mubr.msk.f32.mxu0 %vm2543_vm0, %v2544_v6 }
 0x314   : > { %2268 = vmatmul.mubr.msk.f32.gmra.mrb[16].mxu0 %vm1009_vm5, %v996_v0 }
 0x315   : > { %2270 = vmatprep.mubr.msk.f32.mxu0 %vm2543_vm0, %v2544_v6 }
 0x318   : > { %2271 = vmatmul.mubr.msk.f32.gmra.mrb[18].mxu0 %vm1009_vm5, %v997_v1 }
 0x319   : > { %2273 = vmatprep.mubr.msk.f32.mxu0 %vm2543_vm0, %v2544_v6 }
 0x31c   : > { %2274 = vmatmul.mubr.msk.f32.gmra.mrb[20].mxu0 %vm1009_vm5, %v998_v2  ;;  %v1551_v2 = vld [vmem:[%s3135_s8] sm:$0xff] }
 0x33c   : > { %v1305_v32 = vpop.permute.xlu0 %1304 }
 0x3bb   : > { %v1127_v7 = vpop.f32.mrb[12].mxu0 }
 0x3bc   : > { %v2232_v8 = vpop.f32.mrb[13].mxu0 }
 0x3bd   : > { %v1554_v8 = vld [vmem:[%s3135_s8 + $0x18] sm:$0xff] }
 0x3cf   : > { %v1247_v9 = vpop.f32.mrb[4].mxu0 }
 0x3d0   : > { %1292 = vrot.lane.b32.xlu0 %v1247_v9, %s2547_s30  ;;  %v2251_v10 = vpop.f32.mrb[5].mxu0  ;;  %v1555_v9 = vld [vmem:[%s3135_s8 + $0x20] sm:$0xff] }
 0x3d1   : > { %v1556_v10 = vld [vmem:[%s3135_s8 + $0x28] sm:$0xff] }
 0x3d3   : > { %v1252_v11 = vpop.f32.mrb[6].mxu0 }
 0x3d4   : > { %1308 = vrot.lane.b32.xlu1 %v1252_v11, %s2548_s13  ;;  %v2254_v12 = vpop.f32.mrb[7].mxu0  ;;  %v1557_v11 = vld [vmem:[%s3135_s8 + $0x30] sm:$0xff] }
 0x3d5   : > { %v1558_v12 = vld [vmem:[%s3135_s8 + $0x38] sm:$0xff] }
 0x3d7   : > { %v1257_v13 = vpop.f32.mrb[8].mxu0 }
 0x3d8   : > { %1320 = vrot.lane.b32.xlu1 %v1257_v13, %s2549_s14  ;;  %v2257_v14 = vpop.f32.mrb[9].mxu0  ;;  %v1559_v13 = vld [vmem:[%s3135_s8 + $0x40] sm:$0xff] }
 0x3d9   : > { %v1547_v14 = vpop.f32.mrb[10].mxu1 }
 0x3db   : > { %v1262_v15 = vpop.f32.mrb[10].mxu0 }
 0x3dc   : > { %1332 = vrot.lane.b32.xlu0 %v1262_v15, %s2550_s15  ;;  %v2260_v16 = vpop.f32.mrb[11].mxu0  ;;  %v1548_v15 = vadd.f32 %v1547_v14, %v3001_v30 }
 0x3dd   : > { %v2289_v16 = vpop.f32.mrb[11].mxu1 }
 0x3df   : > { %v1267_v17 = vpop.f32.mrb[22].mxu0 }
 0x3e0   : > { %v1268_v18 = vadd.f32 %v1267_v17, %v1127_v7  ;;  %v2263_v19 = vpop.f32.mrb[23].mxu0  ;;  %v1553_v7 = vld [vmem:[%s3135_s8 + $0x10] sm:$0xff] }
 0x3e3   : > { %v1272_v21 = vpop.f32.mrb[14].mxu0 }
 0x3e4   : > { %1345 = vrot.lane.b32.xlu1 %v1272_v21, %s2551_s18  ;;  %v2266_v22 = vpop.f32.mrb[15].mxu0 }
 0x3e7   : > { %v1277_v23 = vpop.f32.mrb[16].mxu0 }
 0x3e8   : > { %1357 = vrot.lane.b32.xlu0 %v1277_v23, %s2552_s19  ;;  %v2269_v24 = vpop.f32.mrb[17].mxu0 }
 0x3eb   : > { %v1282_v25 = vpop.f32.mrb[18].mxu0 }
 0x3ec   : > { %1369 = vrot.lane.b32.xlu1 %v1282_v25, %s2553_s20  ;;  %v2272_v26 = vpop.f32.mrb[19].mxu0 }
 0x3ef   : > { %v1287_v27 = vpop.f32.mrb[20].mxu0 }
 0x3f0   : > { %1381 = vrot.lane.b32.xlu0 %v1287_v27, %s2554_s23  ;;  %v2275_v28 = vpop.f32.mrb[21].mxu0  ;;  %1702 = vperm.xlu1 %2525, %v1905_v29  }
 0x442   : > { %v1293_v35 = vpop.permute.xlu0 %1292 }
 0x443   : > { %v1301_v37 = vmul.f32 %v3006_v34, %v1293_v35 }
 0x445   : > { %v1307_v43 = vadd.f32 %v1305_v32, %v1301_v37 }
 0x446   : > { %v1309_v33 = vpop.permute.xlu1 %1308 }
 0x447   : > { %v1318_v40 = vmul.f32 %v3011_v36, %v1309_v33 }
 0x449   : > { %v1319_v45 = vadd.f32 %v1318_v40, %v1307_v43 }
 0x44a   : > { %v1321_v39 = vpop.permute.xlu1 %1320 }
 0x44b   : > { %v1330_v44 = vmul.f32 %v3017_v38, %v1321_v39 }
 0x44d   : > { %v1331_v47 = vadd.f32 %v1330_v44, %v1319_v45 }
 0x44e   : > { %v1333_v42 = vpop.permute.xlu0 %1332 }
 0x44f   : > { %v1342_v46 = vmul.f32 %v3023_v41, %v1333_v42 }
 0x451   : > { %v1343_v50 = vadd.f32 %v1342_v46, %v1331_v47 }
 0x453   : > { %v1344_v54 = vadd.f32 %v1343_v50, %v1268_v18 }
 0x456   : > { %v1346_v49 = vpop.permute.xlu1 %1345 }
 0x457   : > { %v1355_v52 = vmul.f32 %v3030_v48, %v1346_v49 }
 0x459   : > { %v1356_v57 = vadd.f32 %v1355_v52, %v1344_v54 }
 0x45a   : > { %v1358_v3 = vpop.permute.xlu0 %1357 }
 0x45b   : > { %v1367_v55 = vmul.f32 %v3035_v51, %v1358_v3 }
 0x45d   : > { %v1368_v60 = vadd.f32 %v1367_v55, %v1356_v57 }
 0x45e   : > { %v1370_v56 = vpop.permute.xlu1 %1369 }
 0x45f   : > { %v1379_v58 = vmul.f32 %v3041_v53, %v1370_v56 }
 0x461   : > { %v1380_v62 = vadd.f32 %v1379_v58, %v1368_v60 }
 0x462   : > { %v1382_v61 = vpop.permute.xlu0 %1381 }
 0x463   : > { %v1391_v63 = vmul.f32 %v3048_v59, %v1382_v61 }
 0x465   : > { %v1392_v0 = vadd.f32 %v1391_v63, %v1380_v62 }
 0x467   : > { %v1394_v1 = vmul.f32 0.01, %v1392_v0  ;;  %vm1393_vm10 = vcmp.ge.f32.partialorder %v1392_v0, 0.0 }
 0x469   : > { %v1395_v4 = vsel %vm1393_vm10, %v1392_v0, %v1394_v1 }
 0x46a   : > { %2291 = vmatpush3.msra.mxu1 %v1395_v4 }
 0x46b   : > { %2293 = vmatmul.mubr.msk.f32.vlgmr.msra.gmra.mrb[12].mxu1 %vm1560_vm11, %v1551_v2 }
 0x46c   : > { %2295 = vmatprep.mubr.msk.f32.mxu1 %vm2543_vm0, %v2544_v6 }
 0x46f   : > { %2296 = vmatmul.mubr.msk.f32.gmra.mrb[14].mxu1 %vm1560_vm11, %v1552_v5  ;;  %v1703_v35 = vpop.permute.xlu1 %1702 }
 0x470   : > { %2298 = vmatprep.mubr.msk.f32.mxu1 %vm2543_vm0, %v2544_v6  ;;  %v1705_v42 = vadd.f32 %v1703_v35, %v1548_v15 }
 0x473   : > { %2299 = vmatmul.mubr.msk.f32.gmra.mrb[16].mxu1 %vm1560_vm11, %v1553_v7 }
 0x474   : > { %2301 = vmatprep.mubr.msk.f32.mxu1 %vm2543_vm0, %v2544_v6 }
 0x477   : > { %2302 = vmatmul.mubr.msk.f32.gmra.mrb[18].mxu1 %vm1560_vm11, %v1554_v8 }
 0x478   : > { %2304 = vmatprep.mubr.msk.f32.mxu1 %vm2543_vm0, %v2544_v6 }
 0x47b   : > { %2305 = vmatmul.mubr.msk.f32.gmra.mrb[20].mxu1 %vm1560_vm11, %v1555_v9 }
 0x47c   : > { %2307 = vmatprep.mubr.msk.f32.mxu1 %vm2543_vm0, %v2544_v6 }
 0x47f   : > { %2308 = vmatmul.mubr.msk.f32.gmra.mrb[22].mxu1 %vm1560_vm11, %v1556_v10 }
 0x480   : > { %2310 = vmatprep.mubr.msk.f32.mxu1 %vm2543_vm0, %v2544_v6 }
 0x483   : > { %2311 = vmatmul.mubr.msk.f32.gmra.mrb[24].mxu1 %vm1560_vm11, %v1557_v11 }
 0x484   : > { %2313 = vmatprep.mubr.msk.f32.mxu1 %vm2543_vm0, %v2544_v6 }
 0x487   : > { %2314 = vmatmul.mubr.msk.f32.gmra.mrb[26].mxu1 %vm1560_vm11, %v1558_v12 }
 0x488   : > { %2316 = vmatprep.mubr.msk.f32.mxu1 %vm2543_vm0, %v2544_v6 }
 0x48b   : > { %2317 = vmatmul.mubr.msk.f32.gmra.mrb[28].mxu1 %vm1560_vm11, %v1559_v13 }
 0x53e   : > { %v1654_v17 = vpop.f32.mrb[12].mxu1 }
 0x53f   : > { %1706 = vrot.lane.b32.xlu0 %v1654_v17, %s2547_s30  ;;  %v2294_v18 = vpop.f32.mrb[13].mxu1 }
 0x542   : > { %v1659_v19 = vpop.f32.mrb[14].mxu1 }
 0x543   : > { %1710 = vrot.lane.b32.xlu1 %v1659_v19, %s2548_s13  ;;  %v2297_v20 = vpop.f32.mrb[15].mxu1 }
 0x546   : > { %v1664_v21 = vpop.f32.mrb[16].mxu1 }
 0x547   : > { %1714 = vrot.lane.b32.xlu0 %v1664_v21, %s2549_s14  ;;  %v2300_v6 = vpop.f32.mrb[17].mxu1  ;;  %s459_s14 = scalar_lea.vmem %s3139_s12, %s2687_s17 }
 0x54a   : > { %v1669_v22 = vpop.f32.mrb[18].mxu1 }
 0x54b   : > { %1718 = vrot.lane.b32.xlu1 %v1669_v22, %s2550_s15  ;;  %v2303_v23 = vpop.f32.mrb[19].mxu1 }
 0x54e   : > { %v1674_v24 = vpop.f32.mrb[20].mxu1 }
 0x54f   : > { %v2306_v25 = vpop.f32.mrb[21].mxu1 }
 0x552   : > { %v1679_v26 = vpop.f32.mrb[22].mxu1 }
 0x553   : > { %1723 = vrot.lane.b32.xlu0 %v1679_v26, %s2551_s18  ;;  %v2309_v27 = vpop.f32.mrb[23].mxu1 }
 0x556   : > { %v1684_v28 = vpop.f32.mrb[24].mxu1 }
 0x557   : > { %1727 = vrot.lane.b32.xlu1 %v1684_v28, %s2552_s19  ;;  %v2312_v29 = vpop.f32.mrb[25].mxu1 }
 0x55a   : > { %v1689_v30 = vpop.f32.mrb[26].mxu1 }
 0x55b   : > { %1731 = vrot.lane.b32.xlu0 %v1689_v30, %s2553_s20  ;;  %v2315_v31 = vpop.f32.mrb[27].mxu1 }
 0x55e   : > { %v1694_v32 = vpop.f32.mrb[28].mxu1 }
 0x55f   : > { %1735 = vrot.lane.b32.xlu1 %v1694_v32, %s2554_s23  ;;  %v2318_v33 = vpop.f32.mrb[29].mxu1 }
 0x5b1   : > { %v1707_v37 = vpop.permute.xlu0 %1706 }
 0x5b2   : > { %v1708_v40 = vmul.f32 %v3006_v34, %v1707_v37 }
 0x5b4   : > { %v1709_v45 = vadd.f32 %v1708_v40, %v1705_v42 }
 0x5b5   : > { %v1711_v39 = vpop.permute.xlu1 %1710 }
 0x5b6   : > { %v1712_v43 = vmul.f32 %v3011_v36, %v1711_v39 }
 0x5b8   : > { %v1713_v47 = vadd.f32 %v1712_v43, %v1709_v45 }
 0x5b9   : > { %v1715_v44 = vpop.permute.xlu0 %1714 }
 0x5ba   : > { %v1716_v46 = vmul.f32 %v3017_v38, %v1715_v44 }
 0x5bc   : > { %v1717_v50 = vadd.f32 %v1716_v46, %v1713_v47 }
 0x5bd   : > { %v1719_v49 = vpop.permute.xlu1 %1718 }
 0x5be   : > { %v1720_v3 = vmul.f32 %v3023_v41, %v1719_v49 }
 0x5c0   : > { %v1721_v52 = vadd.f32 %v1720_v3, %v1717_v50 }
 0x5c2   : > { %v1722_v54 = vadd.f32 %v1721_v52, %v1674_v24 }
 0x5c5   : > { %v1724_v55 = vpop.permute.xlu0 %1723 }
 0x5c6   : > { %v1725_v57 = vmul.f32 %v3030_v48, %v1724_v55 }
 0x5c8   : > { %v1726_v36 = vadd.f32 %v1725_v57, %v1722_v54 }
 0x5c9   : > { %v1728_v56 = vpop.permute.xlu1 %1727 }
 0x5ca   : > { %v1729_v34 = vmul.f32 %v3035_v51, %v1728_v56 }
 0x5cc   : > { %v1730_v61 = vadd.f32 %v1729_v34, %v1726_v36 }
 0x5cd   : > { %v1732_v58 = vpop.permute.xlu0 %1731 }
 0x5ce   : > { %v1733_v60 = vmul.f32 %v3041_v53, %v1732_v58 }
 0x5d0   : > { %v1734_v62 = vadd.f32 %v1733_v60, %v1730_v61 }
 0x5d1   : > { %v1736_v38 = vpop.permute.xlu1 %1735 }
 0x5d2   : > { %v1737_v63 = vmul.f32 %v3048_v59, %v1736_v38 }
 0x5d4   : > { %v1738_v41 = vadd.f32 %v1737_v63, %v1734_v62 }
 0x5d6   : > { %1739 = vst [vmem:[%s459_s14] sm:$0xff] %v1738_v41 }
 0x5d7 PF: > { %s22_s21 = sadd.s32 1, %s2540_s21  }
 0x5d8   : > { %p19_p4 = scmp.ge.s32.totalorder %s22_s21, 4  }
 0x5da   :  { %21 = sbr.rel (!%p19_p4) target bundleno = 1 (0x1), region = 120 }

</bundles_post_ra>
